<compile_context>
chip_gen: v7x
topology: tpu7x:2x2x1
jax: 0.10.0
libtpu: 0.0.40
codegen_flags: <defaults>
</compile_context>

<pallas_src>
import functools

import jax
import jax.numpy as jnp
from jax.experimental import pallas as pl
from jax.experimental.pallas import tpu as pltpu

_BN_EPS = 1e-5


def _choose_row_tile(h_out, w_out, target_rows=1024):
    """Largest divisor of h_out whose tile has <= target_rows matmul rows."""
    best = 1
    for th in range(1, h_out + 1):
        if h_out % th == 0 and th * w_out <= max(target_rows, w_out):
            best = th
    return best


# ------------------------------ Pallas kernel --------------------------------

def _atrous_conv_bn_relu_kernel(x_ref, w_ref, scale_ref, shift_ref, o_ref, *,
                                th, w_out, cin, cout, ksize, dilation):
    """Fused dilated 3x3 conv + per-channel affine (folded BN + bias) + ReLU.

    x_ref:     (1, Hp, Wp, Cin)  zero-padded image (bf16), resident across row tiles
    w_ref:     (K, K, Cin, Cout) weights (bf16)
    scale_ref: (1, Cout) f32     gamma / sqrt(var + eps)
    shift_ref: (1, Cout) f32     beta + (bias - mean) * scale
    o_ref:     (1, th, w_out, Cout) f32
    """
    i = pl.program_id(1)                     # row-tile index -> output rows [i*th, i*th+th)
    acc = jnp.zeros((th * w_out, cout), jnp.float32)
    for kh in range(ksize):
        # Rows needed by this tap: padded rows [i*th + kh*d, i*th + kh*d + th).
        band = x_ref[0, pl.ds(i * th + kh * dilation, th), :, :]      # (th, Wp, Cin)
        for kw in range(ksize):
            win = band[:, kw * dilation:kw * dilation + w_out, :]     # (th, w_out, Cin)
            lhs = win.reshape(th * w_out, cin)
            acc = acc + jnp.dot(lhs, w_ref[kh, kw],
                                preferred_element_type=jnp.float32)
    y = acc * scale_ref[...] + shift_ref[...]
    y = jnp.maximum(y, 0.0)
    o_ref[...] = y.reshape(1, th, w_out, cout).astype(o_ref.dtype)


# ------------------------------ wrapper ---------------------------------------

def atrous_conv_bn_relu(x_nhwc, w_hwio, conv_bias, bn, *, dilation=2, padding=2):
    """Conv2d(k=3, padding, dilation) + BatchNorm2d(eval) + ReLU, fully fused.

    x_nhwc: [N, H, W, Cin] f32; w_hwio: [K, K, Cin, Cout]; bn = (gamma, beta, mean, var).
    Returns [N, Ho, Wo, Cout] f32.
    """
    n, h, wd, cin = x_nhwc.shape
    kh, kw, wcin, cout = w_hwio.shape
    assert kh == kw and wcin == cin
    h_out = h + 2 * padding - dilation * (kh - 1)
    w_out = wd + 2 * padding - dilation * (kw - 1)
    hp, wp = h + 2 * padding, wd + 2 * padding

    gamma, beta, mean, var = bn
    scale = gamma / jnp.sqrt(var + _BN_EPS)
    shift = beta + (conv_bias - mean) * scale

    xp = jnp.pad(x_nhwc, ((0, 0), (padding, padding), (padding, padding), (0, 0)))
    xp = xp.astype(jnp.bfloat16)                 # bf16 DMA, f32 accumulate
    wb = w_hwio.astype(jnp.bfloat16)

    th = _choose_row_tile(h_out, w_out)
    grid = (n, h_out // th)

    kernel = functools.partial(
        _atrous_conv_bn_relu_kernel,
        th=th, w_out=w_out, cin=cin, cout=cout, ksize=kh, dilation=dilation)

    return pl.pallas_call(
        kernel,
        grid=grid,
        in_specs=[
            # Whole padded image of batch b; block index constant over the row axis
            # -> fetched once per batch, resident across all row tiles.
            pl.BlockSpec((1, hp, wp, cin), lambda b, i: (b, 0, 0, 0)),
            pl.BlockSpec((kh, kw, cin, cout), lambda b, i: (0, 0, 0, 0)),
            pl.BlockSpec((1, cout), lambda b, i: (0, 0)),
            pl.BlockSpec((1, cout), lambda b, i: (0, 0)),
        ],
        out_specs=pl.BlockSpec((1, th, w_out, cout), lambda b, i: (b, i, 0, 0)),
        out_shape=jax.ShapeDtypeStruct((n, h_out, w_out, cout), jnp.float32),
        compiler_params=pltpu.CompilerParams(
            dimension_semantics=("parallel", "arbitrary")),
    )(xp, wb, scale[None].astype(jnp.float32), shift[None].astype(jnp.float32))


# ------------------------- public module forward (NCHW) -----------------------

def bottleneck_forward(x_nchw, params):
    """PyTorch Bottleneck.forward: atrous conv -> BN -> ReLU (NCHW in / NCHW out)."""
    x = jnp.transpose(x_nchw, (0, 2, 3, 1))                  # NCHW -> NHWC
    y = atrous_conv_bn_relu(
        x, params["w"], params["b"],
        (params["gamma"], params["beta"], params["mean"], params["var"]),
        dilation=2, padding=2)
    return jnp.transpose(y, (0, 3, 1, 2))                    # NHWC -> NCHW


# ------------------------------ pure-JAX reference ----------------------------

def bottleneck_reference(x_nchw, params):
    x = jnp.transpose(x_nchw, (0, 2, 3, 1))
    y = jax.lax.conv_general_dilated(
        x.astype(jnp.bfloat16), params["w"].astype(jnp.bfloat16),
        window_strides=(1, 1), padding=((2, 2), (2, 2)),
        rhs_dilation=(2, 2),
        dimension_numbers=("NHWC", "HWIO", "NHWC"),
        preferred_element_type=jnp.float32)
    y = y + params["b"]
    scale = params["gamma"] / jnp.sqrt(params["var"] + _BN_EPS)
    y = (y - params["mean"]) * scale + params["beta"]
    y = jnp.maximum(y, 0.0)
    return jnp.transpose(y, (0, 3, 1, 2))


# ---------------------------------- main ---------------------------------------

if __name__ == "__main__":
    N, CIN, COUT, H, W = 2, 64, 128, 16, 16   # small shapes; Cout=128 keeps stores lane-dense
    keys = jax.random.split(jax.random.PRNGKey(0), 7)
    x = jax.random.normal(keys[0], (N, CIN, H, W), jnp.float32)
    params = {
        # HWIO weight layout (PyTorch OIHW weight transposed to (KH, KW, Cin, Cout)).
        "w": jax.random.normal(keys[1], (3, 3, CIN, COUT), jnp.float32)
             / jnp.sqrt(9.0 * CIN),
        "b": 0.1 * jax.random.normal(keys[2], (COUT,), jnp.float32),
        "gamma": 1.0 + 0.1 * jax.random.normal(keys[3], (COUT,), jnp.float32),
        "beta": 0.1 * jax.random.normal(keys[4], (COUT,), jnp.float32),
        "mean": 0.1 * jax.random.normal(keys[5], (COUT,), jnp.float32),
        "var": jnp.abs(1.0 + 0.1 * jax.random.normal(keys[6], (COUT,), jnp.float32)),
    }

    fwd = jax.jit(lambda inp: bottleneck_forward(inp, params))
    out = jax.block_until_ready(fwd(x))

    ref = jax.block_until_ready(jax.jit(lambda inp: bottleneck_reference(inp, params))(x))

    assert out.shape == (N, COUT, H, W), out.shape
    assert jnp.all(jnp.isfinite(out))
    max_err = float(jnp.max(jnp.abs(out - ref)))
    assert max_err < 5e-2, max_err
    print("KERNEL_OK")
</pallas_src>

<mosaic_0001>
module attributes {stable_mosaic.version = 11 : i64} {
  func.func @_atrous_conv_bn_relu_kernel(%arg0: i32, %arg1: i32, %arg2: memref<1x20x20x64xbf16, #tpu.memory_space<vmem>>, %arg3: memref<3x3x64x128xbf16, #tpu.memory_space<vmem>>, %arg4: memref<1x128xf32, #tpu.memory_space<vmem>>, %arg5: memref<1x128xf32, #tpu.memory_space<vmem>>, %arg6: memref<1x16x16x128xf32, #tpu.memory_space<vmem>>) attributes {dimension_semantics = [#tpu.dimension_semantics<parallel>, #tpu.dimension_semantics<arbitrary>], iteration_bounds = array<i64: 2, 1>, scalar_prefetch = 0 : i64, scratch_operands = 0 : i64, tpu.core_type = #tpu.core_type<tc>, window_params = [{transform_indices = @transform_0, window_bounds = array<i64: 1, 20, 20, 64>}, {pipeline_mode = #tpu.pipeline_mode<synchronous>, transform_indices = @transform_1, window_bounds = array<i64: 3, 3, 64, 128>}, {pipeline_mode = #tpu.pipeline_mode<synchronous>, transform_indices = @transform_2, window_bounds = array<i64: 1, 128>}, {pipeline_mode = #tpu.pipeline_mode<synchronous>, transform_indices = @transform_3, window_bounds = array<i64: 1, 128>}, {transform_indices = @transform_4, window_bounds = array<i64: 1, 16, 16, 128>}]} {
    %cst = arith.constant 0.000000e+00 : f32
    %0 = vector.broadcast %cst : f32 to vector<256x128xf32>
    %c16_i32 = arith.constant 16 : i32
    %1 = arith.muli %arg1, %c16_i32 : i32
    %c0_i32 = arith.constant 0 : i32
    %2 = arith.addi %1, %c0_i32 : i32
    %c0 = arith.constant 0 : index
    %3 = arith.index_cast %2 : i32 to index
    %c0_0 = arith.constant 0 : index
    %c0_1 = arith.constant 0 : index
    %4 = vector.load %arg2[%c0, %3, %c0_0, %c0_1] : memref<1x20x20x64xbf16, #tpu.memory_space<vmem>>, vector<1x16x20x64xbf16>
    %5 = vector.shape_cast %4 : vector<1x16x20x64xbf16> to vector<16x20x64xbf16>
    %6 = vector.extract_strided_slice %5 {offsets = [0, 0, 0], sizes = [16, 16, 64], strides = [1, 1, 1]} : vector<16x20x64xbf16> to vector<16x16x64xbf16>
    %7 = vector.shape_cast %6 : vector<16x16x64xbf16> to vector<256x64xbf16>
    %c0_2 = arith.constant 0 : index
    %c0_3 = arith.constant 0 : index
    %c0_4 = arith.constant 0 : index
    %c0_5 = arith.constant 0 : index
    %8 = vector.load %arg3[%c0_2, %c0_3, %c0_4, %c0_5] : memref<3x3x64x128xbf16, #tpu.memory_space<vmem>>, vector<1x1x64x128xbf16>
    %9 = vector.shape_cast %8 : vector<1x1x64x128xbf16> to vector<64x128xbf16>
    %cst_6 = arith.constant dense<0.000000e+00> : vector<256x128xf32>
    %10 = tpu.matmul %7, %9, %cst_6 {dimension_numbers = #tpu.dot_dimension_numbers<[1], [0], [0], [1], [0, 0, 1, 1], [], []>} : vector<256x64xbf16>, vector<64x128xbf16>, vector<256x128xf32> -> vector<256x128xf32>
    %11 = arith.addf %0, %10 : vector<256x128xf32>
    %12 = vector.extract_strided_slice %5 {offsets = [0, 2, 0], sizes = [16, 16, 64], strides = [1, 1, 1]} : vector<16x20x64xbf16> to vector<16x16x64xbf16>
    %13 = vector.shape_cast %12 : vector<16x16x64xbf16> to vector<256x64xbf16>
    %c0_7 = arith.constant 0 : index
    %c1 = arith.constant 1 : index
    %c0_8 = arith.constant 0 : index
    %c0_9 = arith.constant 0 : index
    %14 = vector.load %arg3[%c0_7, %c1, %c0_8, %c0_9] : memref<3x3x64x128xbf16, #tpu.memory_space<vmem>>, vector<1x1x64x128xbf16>
    %15 = vector.shape_cast %14 : vector<1x1x64x128xbf16> to vector<64x128xbf16>
    %cst_10 = arith.constant dense<0.000000e+00> : vector<256x128xf32>
    %16 = tpu.matmul %13, %15, %cst_10 {dimension_numbers = #tpu.dot_dimension_numbers<[1], [0], [0], [1], [0, 0, 1, 1], [], []>} : vector<256x64xbf16>, vector<64x128xbf16>, vector<256x128xf32> -> vector<256x128xf32>
    %17 = arith.addf %11, %16 : vector<256x128xf32>
    %18 = vector.extract_strided_slice %5 {offsets = [0, 4, 0], sizes = [16, 16, 64], strides = [1, 1, 1]} : vector<16x20x64xbf16> to vector<16x16x64xbf16>
    %19 = vector.shape_cast %18 : vector<16x16x64xbf16> to vector<256x64xbf16>
    %c0_11 = arith.constant 0 : index
    %c2 = arith.constant 2 : index
    %c0_12 = arith.constant 0 : index
    %c0_13 = arith.constant 0 : index
    %20 = vector.load %arg3[%c0_11, %c2, %c0_12, %c0_13] : memref<3x3x64x128xbf16, #tpu.memory_space<vmem>>, vector<1x1x64x128xbf16>
    %21 = vector.shape_cast %20 : vector<1x1x64x128xbf16> to vector<64x128xbf16>
    %cst_14 = arith.constant dense<0.000000e+00> : vector<256x128xf32>
    %22 = tpu.matmul %19, %21, %cst_14 {dimension_numbers = #tpu.dot_dimension_numbers<[1], [0], [0], [1], [0, 0, 1, 1], [], []>} : vector<256x64xbf16>, vector<64x128xbf16>, vector<256x128xf32> -> vector<256x128xf32>
    %23 = arith.addf %17, %22 : vector<256x128xf32>
    %c16_i32_15 = arith.constant 16 : i32
    %24 = arith.muli %arg1, %c16_i32_15 : i32
    %c2_i32 = arith.constant 2 : i32
    %25 = arith.addi %24, %c2_i32 : i32
    %c0_16 = arith.constant 0 : index
    %26 = arith.index_cast %25 : i32 to index
    %c0_17 = arith.constant 0 : index
    %c0_18 = arith.constant 0 : index
    %27 = vector.load %arg2[%c0_16, %26, %c0_17, %c0_18] : memref<1x20x20x64xbf16, #tpu.memory_space<vmem>>, vector<1x16x20x64xbf16>
    %28 = vector.shape_cast %27 : vector<1x16x20x64xbf16> to vector<16x20x64xbf16>
    %29 = vector.extract_strided_slice %28 {offsets = [0, 0, 0], sizes = [16, 16, 64], strides = [1, 1, 1]} : vector<16x20x64xbf16> to vector<16x16x64xbf16>
    %30 = vector.shape_cast %29 : vector<16x16x64xbf16> to vector<256x64xbf16>
    %c1_19 = arith.constant 1 : index
    %c0_20 = arith.constant 0 : index
    %c0_21 = arith.constant 0 : index
    %c0_22 = arith.constant 0 : index
    %31 = vector.load %arg3[%c1_19, %c0_20, %c0_21, %c0_22] : memref<3x3x64x128xbf16, #tpu.memory_space<vmem>>, vector<1x1x64x128xbf16>
    %32 = vector.shape_cast %31 : vector<1x1x64x128xbf16> to vector<64x128xbf16>
    %cst_23 = arith.constant dense<0.000000e+00> : vector<256x128xf32>
    %33 = tpu.matmul %30, %32, %cst_23 {dimension_numbers = #tpu.dot_dimension_numbers<[1], [0], [0], [1], [0, 0, 1, 1], [], []>} : vector<256x64xbf16>, vector<64x128xbf16>, vector<256x128xf32> -> vector<256x128xf32>
    %34 = arith.addf %23, %33 : vector<256x128xf32>
    %35 = vector.extract_strided_slice %28 {offsets = [0, 2, 0], sizes = [16, 16, 64], strides = [1, 1, 1]} : vector<16x20x64xbf16> to vector<16x16x64xbf16>
    %36 = vector.shape_cast %35 : vector<16x16x64xbf16> to vector<256x64xbf16>
    %c1_24 = arith.constant 1 : index
    %c1_25 = arith.constant 1 : index
    %c0_26 = arith.constant 0 : index
    %c0_27 = arith.constant 0 : index
    %37 = vector.load %arg3[%c1_24, %c1_25, %c0_26, %c0_27] : memref<3x3x64x128xbf16, #tpu.memory_space<vmem>>, vector<1x1x64x128xbf16>
    %38 = vector.shape_cast %37 : vector<1x1x64x128xbf16> to vector<64x128xbf16>
    %cst_28 = arith.constant dense<0.000000e+00> : vector<256x128xf32>
    %39 = tpu.matmul %36, %38, %cst_28 {dimension_numbers = #tpu.dot_dimension_numbers<[1], [0], [0], [1], [0, 0, 1, 1], [], []>} : vector<256x64xbf16>, vector<64x128xbf16>, vector<256x128xf32> -> vector<256x128xf32>
    %40 = arith.addf %34, %39 : vector<256x128xf32>
    %41 = vector.extract_strided_slice %28 {offsets = [0, 4, 0], sizes = [16, 16, 64], strides = [1, 1, 1]} : vector<16x20x64xbf16> to vector<16x16x64xbf16>
    %42 = vector.shape_cast %41 : vector<16x16x64xbf16> to vector<256x64xbf16>
    %c1_29 = arith.constant 1 : index
    %c2_30 = arith.constant 2 : index
    %c0_31 = arith.constant 0 : index
    %c0_32 = arith.constant 0 : index
    %43 = vector.load %arg3[%c1_29, %c2_30, %c0_31, %c0_32] : memref<3x3x64x128xbf16, #tpu.memory_space<vmem>>, vector<1x1x64x128xbf16>
    %44 = vector.shape_cast %43 : vector<1x1x64x128xbf16> to vector<64x128xbf16>
    %cst_33 = arith.constant dense<0.000000e+00> : vector<256x128xf32>
    %45 = tpu.matmul %42, %44, %cst_33 {dimension_numbers = #tpu.dot_dimension_numbers<[1], [0], [0], [1], [0, 0, 1, 1], [], []>} : vector<256x64xbf16>, vector<64x128xbf16>, vector<256x128xf32> -> vector<256x128xf32>
    %46 = arith.addf %40, %45 : vector<256x128xf32>
    %c16_i32_34 = arith.constant 16 : i32
    %47 = arith.muli %arg1, %c16_i32_34 : i32
    %c4_i32 = arith.constant 4 : i32
    %48 = arith.addi %47, %c4_i32 : i32
    %c0_35 = arith.constant 0 : index
    %49 = arith.index_cast %48 : i32 to index
    %c0_36 = arith.constant 0 : index
    %c0_37 = arith.constant 0 : index
    %50 = vector.load %arg2[%c0_35, %49, %c0_36, %c0_37] : memref<1x20x20x64xbf16, #tpu.memory_space<vmem>>, vector<1x16x20x64xbf16>
    %51 = vector.shape_cast %50 : vector<1x16x20x64xbf16> to vector<16x20x64xbf16>
    %52 = vector.extract_strided_slice %51 {offsets = [0, 0, 0], sizes = [16, 16, 64], strides = [1, 1, 1]} : vector<16x20x64xbf16> to vector<16x16x64xbf16>
    %53 = vector.shape_cast %52 : vector<16x16x64xbf16> to vector<256x64xbf16>
    %c2_38 = arith.constant 2 : index
    %c0_39 = arith.constant 0 : index
    %c0_40 = arith.constant 0 : index
    %c0_41 = arith.constant 0 : index
    %54 = vector.load %arg3[%c2_38, %c0_39, %c0_40, %c0_41] : memref<3x3x64x128xbf16, #tpu.memory_space<vmem>>, vector<1x1x64x128xbf16>
    %55 = vector.shape_cast %54 : vector<1x1x64x128xbf16> to vector<64x128xbf16>
    %cst_42 = arith.constant dense<0.000000e+00> : vector<256x128xf32>
    %56 = tpu.matmul %53, %55, %cst_42 {dimension_numbers = #tpu.dot_dimension_numbers<[1], [0], [0], [1], [0, 0, 1, 1], [], []>} : vector<256x64xbf16>, vector<64x128xbf16>, vector<256x128xf32> -> vector<256x128xf32>
    %57 = arith.addf %46, %56 : vector<256x128xf32>
    %58 = vector.extract_strided_slice %51 {offsets = [0, 2, 0], sizes = [16, 16, 64], strides = [1, 1, 1]} : vector<16x20x64xbf16> to vector<16x16x64xbf16>
    %59 = vector.shape_cast %58 : vector<16x16x64xbf16> to vector<256x64xbf16>
    %c2_43 = arith.constant 2 : index
    %c1_44 = arith.constant 1 : index
    %c0_45 = arith.constant 0 : index
    %c0_46 = arith.constant 0 : index
    %60 = vector.load %arg3[%c2_43, %c1_44, %c0_45, %c0_46] : memref<3x3x64x128xbf16, #tpu.memory_space<vmem>>, vector<1x1x64x128xbf16>
    %61 = vector.shape_cast %60 : vector<1x1x64x128xbf16> to vector<64x128xbf16>
    %cst_47 = arith.constant dense<0.000000e+00> : vector<256x128xf32>
    %62 = tpu.matmul %59, %61, %cst_47 {dimension_numbers = #tpu.dot_dimension_numbers<[1], [0], [0], [1], [0, 0, 1, 1], [], []>} : vector<256x64xbf16>, vector<64x128xbf16>, vector<256x128xf32> -> vector<256x128xf32>
    %63 = arith.addf %57, %62 : vector<256x128xf32>
    %64 = vector.extract_strided_slice %51 {offsets = [0, 4, 0], sizes = [16, 16, 64], strides = [1, 1, 1]} : vector<16x20x64xbf16> to vector<16x16x64xbf16>
    %65 = vector.shape_cast %64 : vector<16x16x64xbf16> to vector<256x64xbf16>
    %c2_48 = arith.constant 2 : index
    %c2_49 = arith.constant 2 : index
    %c0_50 = arith.constant 0 : index
    %c0_51 = arith.constant 0 : index
    %66 = vector.load %arg3[%c2_48, %c2_49, %c0_50, %c0_51] : memref<3x3x64x128xbf16, #tpu.memory_space<vmem>>, vector<1x1x64x128xbf16>
    %67 = vector.shape_cast %66 : vector<1x1x64x128xbf16> to vector<64x128xbf16>
    %cst_52 = arith.constant dense<0.000000e+00> : vector<256x128xf32>
    %68 = tpu.matmul %65, %67, %cst_52 {dimension_numbers = #tpu.dot_dimension_numbers<[1], [0], [0], [1], [0, 0, 1, 1], [], []>} : vector<256x64xbf16>, vector<64x128xbf16>, vector<256x128xf32> -> vector<256x128xf32>
    %69 = arith.addf %63, %68 : vector<256x128xf32>
    %c0_53 = arith.constant 0 : index
    %c0_54 = arith.constant 0 : index
    %70 = vector.load %arg4[%c0_53, %c0_54] : memref<1x128xf32, #tpu.memory_space<vmem>>, vector<1x128xf32>
    %71 = vector.broadcast %70 : vector<1x128xf32> to vector<256x128xf32>
    %72 = arith.mulf %69, %71 : vector<256x128xf32>
    %c0_55 = arith.constant 0 : index
    %c0_56 = arith.constant 0 : index
    %73 = vector.load %arg5[%c0_55, %c0_56] : memref<1x128xf32, #tpu.memory_space<vmem>>, vector<1x128xf32>
    %74 = vector.broadcast %73 : vector<1x128xf32> to vector<256x128xf32>
    %75 = arith.addf %72, %74 : vector<256x128xf32>
    %cst_57 = arith.constant 0.000000e+00 : f32
    %76 = vector.broadcast %cst_57 : f32 to vector<256x128xf32>
    %77 = arith.maximumf %75, %76 : vector<256x128xf32>
    %78 = vector.shape_cast %77 : vector<256x128xf32> to vector<1x16x16x128xf32>
    %c0_58 = arith.constant 0 : index
    %c0_59 = arith.constant 0 : index
    %c0_60 = arith.constant 0 : index
    %c0_61 = arith.constant 0 : index
    %79 = vector.load %arg6[%c0_58, %c0_59, %c0_60, %c0_61] : memref<1x16x16x128xf32, #tpu.memory_space<vmem>>, vector<1x16x16x128xf32>
    tpu.vector_store %arg6[%c0_58, %c0_59, %c0_60, %c0_61], %78 {strides = array<i32>} : memref<1x16x16x128xf32, #tpu.memory_space<vmem>>, vector<1x16x16x128xf32>,
    return
  }
  func.func @transform_0(%arg0: i32, %arg1: i32) -> (i32, i32, i32, i32) {
    %c0_i32 = arith.constant 0 : i32
    %c0_i32_0 = arith.constant 0 : i32
    %c0_i32_1 = arith.constant 0 : i32
    %c0_i32_2 = arith.constant 0 : i32
    return %arg0, %c0_i32, %c0_i32_0, %c0_i32_1 : i32, i32, i32, i32
  }
  func.func @transform_1(%arg0: i32, %arg1: i32) -> (i32, i32, i32, i32) {
    %c0_i32 = arith.constant 0 : i32
    %c0_i32_0 = arith.constant 0 : i32
    %c0_i32_1 = arith.constant 0 : i32
    %c0_i32_2 = arith.constant 0 : i32
    %c0_i32_3 = arith.constant 0 : i32
    return %c0_i32, %c0_i32_0, %c0_i32_1, %c0_i32_2 : i32, i32, i32, i32
  }
  func.func @transform_2(%arg0: i32, %arg1: i32) -> (i32, i32) {
    %c0_i32 = arith.constant 0 : i32
    %c0_i32_0 = arith.constant 0 : i32
    %c0_i32_1 = arith.constant 0 : i32
    return %c0_i32, %c0_i32_0 : i32, i32
  }
  func.func @transform_3(%arg0: i32, %arg1: i32) -> (i32, i32) {
    %c0_i32 = arith.constant 0 : i32
    %c0_i32_0 = arith.constant 0 : i32
    %c0_i32_1 = arith.constant 0 : i32
    return %c0_i32, %c0_i32_0 : i32, i32
  }
  func.func @transform_4(%arg0: i32, %arg1: i32) -> (i32, i32, i32, i32) {
    %c0_i32 = arith.constant 0 : i32
    %c0_i32_0 = arith.constant 0 : i32
    %c0_i32_1 = arith.constant 0 : i32
    return %arg0, %arg1, %c0_i32, %c0_i32_0 : i32, i32, i32, i32
  }
}

</mosaic_0001>

<bundles_post_ra>
// kernel: _lambda_.1
= control target key start
LH: loop header
LB: loop body
LE: loop exit
PB: predicated region body
PF: predicated region fallthrough
CT: control target
= control target key end

     0   :  { %9 = vsyncpa [#allocation3], 0  ;;  %s8094_s0 = inlined_call_operand.vmem [shape: bf16[2,20,20,64], index: 0, kind: input, shape index: {}]   ;;  %s8095_s1 = inlined_call_operand.vmem [shape: bf16[3,3,64,128], index: 1, kind: input, shape index: {}]   ;;  %s8096_s2 = inlined_call_operand.vmem [shape: f32[1,128], index: 2, kind: input, shape index: {}]   ;;  %s8097_s3 = inlined_call_operand.vmem [shape: f32[1,128], index: 3, kind: input, shape index: {}]   ;;  %s8098_s4 = inlined_call_operand.hbm [shape: f32[2,16,16,128], index: 4, kind: output, shape index: {}]  }
   0x1   :  { %11 = vsyncpa [#allocation3 + $0x1], 0  ;;  %s5999_s15 = smov 0   ;;  %s6001_s16 = smov 0  }
   0x2   :  { %s6003_s17 = smov 0   ;;  %s6005_s18 = smov 0  }
   0x3   :  { %s6007_s19 = smov 0   ;;  %s6009_s20 = smov 0  }
   0x4 LB: > { %s4266_s21 = sadd.s32 4294967295, %s5969_s20   ;;  %s4267_s22 = sadd.s32 4294967294, %s5969_s20   ;;  %s5969_s20 = sphi %s6009_s20, %s17_s20   ;;  %s5965_s19 = sphi %s6007_s19, %s8337_s19   ;;  %s5961_s18 = sphi %s6005_s18, %s8336_s18   ;;  %s5957_s17 = sphi %s6003_s17, %s8335_s17   ;;  %s5953_s16 = sphi %s6001_s16, %s8334_s16   ;;  %s5949_s15 = sphi %s5999_s15, %s8333_s15  }
   0x5   : > { %s29_s23 = sadd.s32 1, %s5965_s19  ;;  %s127_s24 = sadd.s32 1, %s5957_s17 }
   0x6   : > { %p31_p0 = scmp.ge.s32.totalorder %s29_s23, 2  ;;  %p137_p1 = scmp.ne.s32.totalorder %s5957_s17, %s5953_s16 }
   0x7   : > { %p138_p2 = scmp.eq.s32.totalorder %s4266_s21, 1  ;;  %p143_p3 = scmp.ne.s32.totalorder %s5953_s16, %s5949_s15 }
   0x8   : > { %s8339_s23 = smov (%p31_p0, %s29_s23), 0  ;;  %p144_p5 = scmp.eq.s32.totalorder %s4267_s22, 1 }
   0x9   : > { %p6039_p4 = por %p138_p2, %p137_p1  ;;  %s122_s26 = ssub.s32 %s5965_s19, %s8339_s23 }
   0xa   : > { %p4270_p6 = scmp.ge.s32.totalorder %s5969_s20, 1  ;;  %p125_p7 = scmp.eq.s32.totalorder %s122_s26, 0 }
   0xb   : > { %p6046_p8 = por %p144_p5, %p143_p3  ;;  %p179_p9 = scmp.lt.s32.totalorder %s5969_s20, 3 }
   0xc   : > { %s6052_s28 = scalar_select %p125_p7, %s5957_s17, %s127_s24  }
   0xd   : > { %p180_p10 = pnand %p4270_p6, %p179_p9 }
   0xf   : > { %183 = sbr.rel (%p180_p10) target bundleno = 571 (0x23b), region = 36 }
  0x16   : > { %v5723_v0 = vld [vmem:[%s8095_s1 + $0x20] sm:$0xff]   ;;  %p205_p11 = scmp.lt.s32.totalorder %s5961_s18, 1  ;;  %v5725_v2 = vld [vmem:[%s8095_s1 + $0x28] sm:$0xff]   ;;  %v5727_v4 = vld [vmem:[%s8095_s1 + $0x30] sm:$0xff]   ;;  %vm320_vm0 = vcmask 1042432   ;;  %vm321_vm1 = vcmask 1046532  }
  0x17   : > { %v5724_v1 = vld [vmem:[%s8095_s1 + $0x80] sm:$0xff]   ;;  %5041 = vmatprep.subr.bf16.mxu1 %v5723_v0  ;;  %v5726_v3 = vld [vmem:[%s8095_s1 + $0x88] sm:$0xff]   ;;  %v5728_v5 = vld [vmem:[%s8095_s1 + $0x90] sm:$0xff]   ;;  %vm516_vm2 = vcmask 523264   ;;  %vm1007_vm4 = vcmask 1041408   ;;  %vm1008_vm5 = vcmask 1045508  }
  0x18   : > { %s206_s9 = scalar_select %p205_p11, %s5961_s18, 1  ;;  %5201 = vmatprep.subr.bf16.mxu0 %v5724_v1  ;;  %5042 = vmatpush3.bf16.msra.mxu1 %v5723_v0  ;;  %v5729_v6 = vld [vmem:[%s8095_s1 + $0x38] sm:$0xff]   ;;  %vm6094_vm3 = vmor %vm320_vm0, %vm321_vm1  ;;  %v6124_v26 = vld [vmem:[%s8095_s1] sm:$0xff]  }
  0x19   : > { %5202 = vmatpush3.bf16.msra.mxu0 %v5724_v1  ;;  %5043 = vmatprep.subr.bf16.mxu1 %v5725_v2  ;;  %v5730_v10 = vld [vmem:[%s8095_s1 + $0x98] sm:$0xff]   ;;  %v6147_v41 = vld [vmem:[%s8095_s1 + $0xa0] sm:$0xff]   ;;  %vm6314_vm6 = vmor %vm1007_vm4, %vm1008_vm5  ;;  %s4860_s26 = sshll.u32 %s5961_s18, 12 }
  0x1a   : > { %s5665_s14 = smul.u32 240, %s206_s9  ;;  %5203 = vmatprep.subr.bf16.mxu0 %v5726_v3  ;;  %s8039_s7 = scalar_lea.hbm %s8098_s4, %s4860_s26 }
  0x1b   : > { %s5971_s9 = smov [#allocation2]  }
  0x1c   : > { %s6077_s29 = scalar_lea.vmem %s8094_s0, %s5665_s14  ;;  %5044 = vmatpush3.bf16.msra.mxu1 %v5725_v2  ;;  %s5895_s10 = sshll.u32 %s5971_s9, 4  ;;  %s5896_s10 = int_to_ptr.vmem [resolvable:$false] %s5895_s10 }
  0x1d   : > { %5204 = vmatpush3.bf16.msra.mxu0 %v5726_v3  ;;  %5045 = vmatprep.subr.bf16.mxu1 %v5727_v4  ;;  %v6083_v7 = vld [vmem:[%s6077_s29] sm:$0xf]  ;;  %v6086_v8 = vld [vmem:[%s6077_s29 + $0x4] sm:$0xf]  ;;  %v6089_v9 = vld [vmem:[%s6077_s29 + $0x8] sm:$0x3] }
  0x1e   : > { %5205 = vmatprep.subr.bf16.mxu0 %v5728_v5  ;;  %v4273_v12 = vrot.slane %v6083_v7, 9  ;;  %v325_v13 = vrot.slane %v6086_v8, 5  ;;  %v328_v14 = vrot.slane %v6089_v9, 5  ;;  %v6102_v15 = vld [vmem:[%s6077_s29 + $0x18] sm:$0xf]  ;;  %v4369_v16 = vrot.slane %v6083_v7, 10 }
  0x1f   : > { %v8099_v17 = vrot.slane %v6086_v8, 6  ;;  %v6107_v18 = vld [vmem:[%s6077_s29 + $0x1c] sm:$0xf]  ;;  %v6110_v19 = vld [vmem:[%s6077_s29 + $0x20] sm:$0x3]  ;;  %v4521_v23 = vrot.slane %v6102_v15, 9 }
  0x20   : > { %5046 = vmatpush3.bf16.msra.mxu1 %v5727_v4  ;;  %v326_v21 = vsel %vm6094_vm3, %v4273_v12, %v325_v13  ;;  %v327_v22 = vrot.slane %v325_v13, 4  ;;  %v1868_v24 = vrot.slane %v6107_v18, 5  ;;  %v6119_v25 = vld [vmem:[%s6077_s29 + $0xc] sm:$0xf]  ;;  %v1871_v27 = vrot.slane %v6110_v19, 5  ;;  %s5897_s11 = scalar_lea.vmem %s5896_s10, 8192 }
  0x21   : > { %5206 = vmatpush3.bf16.msra.mxu0 %v5728_v5  ;;  %5047 = vmatprep.subr.bf16.mxu1 %v5729_v6  ;;  %v4581_v28 = vrot.slane %v6102_v15, 10  ;;  %v8105_v29 = vrot.slane %v6107_v18, 6  ;;  %v6131_v31 = vld [vmem:[%s6077_s29 + $0x10] sm:$0xf]  ;;  %v6138_v35 = vld [vmem:[%s6077_s29 + $0x14] sm:$0x3] }
  0x22   : > { %5207 = vmatprep.subr.bf16.mxu0 %v5730_v10  ;;  %v329_v32 = vsel %vm6094_vm3, %v327_v22, %v328_v14  ;;  %v1869_v33 = vsel %vm6094_vm3, %v4521_v23, %v1868_v24  ;;  %v1870_v34 = vrot.slane %v1868_v24, 4  ;;  %v4274_v36 = vrot.slane %v6119_v25, 9  ;;  %v6154_v45 = vld [vmem:[%s6077_s29 + $0x24] sm:$0xf]  ;;  %v6157_v46 = vld [vmem:[%s6077_s29 + $0x28] sm:$0xf] }
  0x23   : > { %v4297_v37 = vcombine.low %v326_v21, %v329_v32  ;;  %v332_v38 = vrot.slane %v6131_v31, 5  ;;  %v335_v39 = vrot.slane %v6138_v35, 5  ;;  %v4370_v40 = vrot.slane %v6119_v25, 10  ;;  %v6163_v50 = vld [vmem:[%s6077_s29 + $0x2c] sm:$0x3]  ;;  %v5739_v15 = vld [vmem:[%s8095_s1 + $0x18] sm:$0xff]  }
  0x24   : > { %5048 = vmatpush3.bf16.msra.mxu1 %v5729_v6  ;;  %v1872_v42 = vsel %vm6094_vm3, %v1870_v34, %v1871_v27  ;;  %v1019_v43 = vrot.slane %v6131_v31, 6  ;;  %v4522_v51 = vrot.slane %v6154_v45, 9  ;;  %v1875_v53 = vrot.slane %v6157_v46, 5  ;;  %v6181_v59 = vld [vmem:[%s6077_s29 + $0x18] sm:$0xf]  ;;  %v5733_v23 = vld [vmem:[%s8095_s1 + $0xa8] sm:$0xff]  }
  0x25   : > { %5208 = vmatpush3.bf16.msra.mxu0 %v5730_v10  ;;  %5049 = vmatprep.mubr.msk.bf16.mxu1 %vm516_vm2, %v4297_v37  ;;  %v4545_v47 = vcombine.low %v1869_v33, %v1872_v42  ;;  %v333_v48 = vsel %vm6094_vm3, %v4274_v36, %v332_v38  ;;  %v334_v49 = vrot.slane %v332_v38, 4  ;;  %v1878_v54 = vrot.slane %v6163_v50, 5  ;;  %v6184_v60 = vld [vmem:[%s6077_s29 + $0x1c] sm:$0xf]  ;;  %v224_v1 = vld [vmem:[%s6077_s29 + $0x20] sm:$0x3] }
  0x26   : > { %v6168_v52 = vrot.slane %v1019_v43, 4  ;;  %5081 = vmatprep.subr.bf16.mxu1 %v6124_v26  ;;  %5241 = vmatprep.subr.bf16.mxu0 %v6147_v41  ;;  %v8100_v57 = vrot.slane %v6157_v46, 6  ;;  %v1876_v63 = vsel %vm6094_vm3, %v4522_v51, %v1875_v53  ;;  %v1877_v0 = vrot.slane %v1875_v53, 4  ;;  %v6193_v3 = vld [vmem:[%s6077_s29 + $0x30] sm:$0xf] }
  0x27   : > { %5209 = vmatprep.mubr.msk.bf16.mxu0 %vm516_vm2, %v4545_v47  ;;  %v336_v56 = vsel %vm6094_vm3, %v334_v49, %v335_v39  ;;  %v4275_v2 = vrot.slane %v6181_v59, 9  ;;  %v339_v5 = vrot.slane %v6184_v60, 5  ;;  %v342_v6 = vrot.slane %v224_v1, 5  ;;  %v6201_v10 = vld [vmem:[%s6077_s29 + $0x34] sm:$0xf] }
  0x28   : > { %v4298_v62 = vcombine.low %v333_v48, %v336_v56  ;;  %v6197_v4 = vrot.slane %v8100_v57, 4  ;;  %v4523_v12 = vrot.slane %v6193_v3, 9  ;;  %v1879_v13 = vsel %vm6094_vm3, %v1877_v0, %v1878_v54  ;;  %v6208_v14 = vld [vmem:[%s6077_s29 + $0x38] sm:$0x3]  ;;  %v6212_v22 = vld [vmem:[%s6077_s29 + $0x24] sm:$0xf] }
  0x29   : > { %v1882_v21 = vrot.slane %v6201_v10, 5  ;;  %v4546_v24 = vcombine.low %v1876_v63, %v1879_v13  ;;  %v340_v27 = vsel %vm6094_vm3, %v4275_v2, %v339_v5  ;;  %v341_v32 = vrot.slane %v339_v5, 4  ;;  %v6222_v34 = vld [vmem:[%s6077_s29 + $0x28] sm:$0xf]  ;;  %v227_v36 = vld [vmem:[%s6077_s29 + $0x2c] sm:$0x3] }
  0x2a   : > { %5050 = vmatmul.mubr.msk.bf16.vlgmr.msra.gmra.mrb[0].mxu1 %vm516_vm2, %v4298_v62  ;;  %v1885_v33 = vrot.slane %v6208_v14, 5  ;;  %v4276_v39 = vrot.slane %v6212_v22, 9  ;;  %v346_v42 = vrot.slane %v6222_v34, 5  ;;  %v6230_v47 = vld [vmem:[%s6077_s29 + $0x3c] sm:$0xf]  ;;  %v349_v49 = vrot.slane %v227_v36, 5 }
  0x2b   : > { %5082 = vmatpush3.bf16.msra.mxu1 %v6124_v26  ;;  %v1883_v37 = vsel %vm6094_vm3, %v4523_v12, %v1882_v21  ;;  %v1884_v38 = vrot.slane %v1882_v21, 4  ;;  %v5734_v26 = vld [vmem:[%s8095_s1 + $0x8] sm:$0xff]   ;;  %5210 = vmatmul.mubr.msk.bf16.vlgmr.msra.gmra.mrb[0].mxu0 %vm516_vm2, %v4546_v24  ;;  %v343_v48 = vsel %vm6094_vm3, %v341_v32, %v342_v6  ;;  %v6239_v51 = vld [vmem:[%s6077_s29 + $0x40] sm:$0xf]  ;;  %v6242_v53 = vld [vmem:[%s6077_s29 + $0x44] sm:$0x3] }
  0x2c   : > { %v4524_v54 = vrot.slane %v6230_v47, 9  ;;  %5242 = vmatpush3.bf16.msra.mxu0 %v6147_v41  ;;  %v4299_v56 = vcombine.low %v340_v27, %v343_v48  ;;  %v347_v63 = vsel %vm6094_vm3, %v4276_v39, %v346_v42  ;;  %v348_v0 = vrot.slane %v346_v42, 4  ;;  %5083 = vmatprep.subr.bf16.mxu1 %v5734_v26  ;;  %v5735_v1 = vld [vmem:[%s8095_s1 + $0xb0] sm:$0xff]   ;;  %v230_v21 = vld [vmem:[%s6077_s29 + $0x38] sm:$0x3] }
  0x2d   : > { %v1886_v62 = vsel %vm6094_vm3, %v1884_v38, %v1885_v33  ;;  %v1889_v5 = vrot.slane %v6239_v51, 5  ;;  %v1892_v41 = vrot.slane %v6242_v53, 5  ;;  %5243 = vmatprep.subr.bf16.mxu0 %v5733_v23  ;;  %v6256_v6 = vld [vmem:[%s6077_s29 + $0x30] sm:$0xf]  ;;  %v6259_v12 = vld [vmem:[%s6077_s29 + $0x34] sm:$0xf] }
  0x2e   : > { %v4547_v2 = vcombine.low %v1883_v37, %v1886_v62  ;;  %5053 = vmatprep.mubr.msk.bf16.mxu1 %vm516_vm2, %v4299_v56  ;;  %v350_v13 = vsel %vm6094_vm3, %v348_v0, %v349_v49  ;;  %v4277_v24 = vrot.slane %v6256_v6, 9  ;;  %v353_v27 = vrot.slane %v6259_v12, 5  ;;  %v6268_v32 = vld [vmem:[%s6077_s29 + $0x48] sm:$0xf]  ;;  %v6274_v39 = vld [vmem:[%s6077_s29 + $0x4c] sm:$0xf] }
  0x2f   : > { %5084 = vmatpush3.bf16.msra.mxu1 %v5734_v26  ;;  %v4300_v33 = vcombine.low %v347_v63, %v350_v13  ;;  %v1890_v36 = vsel %vm6094_vm3, %v4524_v54, %v1889_v5  ;;  %v1891_v37 = vrot.slane %v1889_v5, 4  ;;  %v356_v38 = vrot.slane %v230_v21, 5  ;;  %v6277_v42 = vld [vmem:[%s6077_s29 + $0x50] sm:$0x3]  ;;  %v6284_v62 = vld [vmem:[%s6077_s29 + $0x3c] sm:$0xf] }
  0x30   : > { %5213 = vmatprep.mubr.msk.bf16.mxu0 %vm516_vm2, %v4547_v2  ;;  %5244 = vmatpush3.bf16.msra.mxu0 %v5733_v23  ;;  %v354_v26 = vsel %vm6094_vm3, %v4277_v24, %v353_v27  ;;  %v355_v48 = vrot.slane %v353_v27, 4  ;;  %v4525_v49 = vrot.slane %v6268_v32, 9  ;;  %v1896_v56 = vrot.slane %v6274_v39, 5  ;;  %8152 = vst [vmem:[#allocation5_spill] sm:$0xff] %v6284_v62  ;;  %v5736_v54 = vld [vmem:[%s8095_s1 + $0xb8] sm:$0xff]  }
  0x31   : > { %v1893_v23 = vsel %vm6094_vm3, %v1891_v37, %v1892_v41  ;;  %v1899_v63 = vrot.slane %v6277_v42, 5  ;;  %v6294_v0 = vld [vmem:[%s6077_s29 + $0x40] sm:$0xf]  ;;  %v233_v2 = vld [vmem:[%s6077_s29 + $0x44] sm:$0x3]  ;;  %v4278_v5 = vrot.slane %v6284_v62, 9  ;;  %5245 = vmatprep.subr.bf16.mxu0 %v5735_v1 }
  0x32   : > { %5054 = vmatmul.mubr.msk.bf16.gmra.mrb[4].mxu1 %vm516_vm2, %v4300_v33  ;;  %v4548_v13 = vcombine.low %v1890_v36, %v1893_v23  ;;  %v357_v21 = vsel %vm6094_vm3, %v355_v48, %v356_v38  ;;  %v1897_v24 = vsel %vm6094_vm3, %v4525_v49, %v1896_v56  ;;  %v1898_v27 = vrot.slane %v1896_v56, 4  ;;  %v5737_v41 = vld [vmem:[%s8095_s1 + $0x10] sm:$0xff]   ;;  %v6310_v58 = vld [vmem:[%s6077_s29 + $0x58] sm:$0xf]  ;;  %v6389_v44 = vld [vmem:[%s6077_s29 + $0x6c] sm:$0xf] }
  0x33   : > { %v4301_v33 = vcombine.low %v354_v26, %v357_v21  ;;  %v360_v37 = vrot.slane %v6294_v0, 5  ;;  %v363_v61 = vrot.slane %v233_v2, 5  ;;  %v6307_v20 = vld [vmem:[%s6077_s29 + $0x54] sm:$0xf]  ;;  %v6322_v26 = vld [vmem:[%s6077_s29 + $0x5c] sm:$0x3]  ;;  %5085 = vmatprep.subr.bf16.mxu1 %v5737_v41  ;;  %v6332_v56 = vsel %vm6314_vm6, %v4369_v16, %v8099_v17 }
  0x34   : > { %5214 = vmatmul.mubr.msk.bf16.gmra.mrb[4].mxu0 %vm516_vm2, %v4548_v13  ;;  %v1900_v38 = vsel %vm6094_vm3, %v1898_v27, %v1899_v63  ;;  %v4526_v48 = vrot.slane %v6307_v20, 9  ;;  %v1903_v49 = vrot.slane %v6310_v58, 5  ;;  %v1906_v13 = vrot.slane %v6322_v26, 5  ;;  %v6339_v21 = vld [vmem:[%s6077_s29 + $0x48] sm:$0xf]  ;;  %5086 = vmatpush3.bf16.msra.mxu1 %v5737_v41 }
  0x35   : > { %5057 = vmatprep.mubr.msk.bf16.mxu1 %vm516_vm2, %v4301_v33  ;;  %v4549_v23 = vcombine.low %v1897_v24, %v1900_v38  ;;  %v361_v63 = vsel %vm6094_vm3, %v4278_v5, %v360_v37  ;;  %v362_v2 = vrot.slane %v360_v37, 4  ;;  %5246 = vmatpush3.bf16.msra.mxu0 %v5735_v1  ;;  %8155 = vst [vmem:[#allocation6_spill] sm:$0xff] %v6339_v21  ;;  %v6344_v17 = vld [vmem:[%s6077_s29 + $0x4c] sm:$0xf]  ;;  %v236_v33 = vld [vmem:[%s6077_s29 + $0x50] sm:$0x3] }
  0x36   : > { %v1904_v27 = vsel %vm6094_vm3, %v4526_v48, %v1903_v49  ;;  %v1905_v16 = vrot.slane %v1903_v49, 4  ;;  %8156 = vst [vmem:[#allocation7_spill] sm:$0xff] %v6344_v17  ;;  %v4279_v24 = vrot.slane %v6339_v21, 9  ;;  %5247 = vmatprep.subr.bf16.mxu0 %v5736_v54  ;;  %v6354_v1 = vsel %vm6314_vm6, %v4370_v40, %v1019_v43  ;;  %v6361_v48 = vld [vmem:[%s6077_s29 + $0x60] sm:$0xf]  ;;  %5087 = vmatprep.subr.bf16.mxu1 %v5739_v15 }
  0x37   : > { %5217 = vmatprep.mubr.msk.bf16.mxu0 %vm516_vm2, %v4549_v23  ;;  %v364_v5 = vsel %vm6094_vm3, %v362_v2, %v363_v61  ;;  %v367_v37 = vrot.slane %v6344_v17, 5  ;;  %v370_v38 = vrot.slane %v236_v33, 5  ;;  %v6364_v41 = vld [vmem:[%s6077_s29 + $0x64] sm:$0xf]  ;;  %v6369_v40 = vld [vmem:[%s6077_s29 + $0x68] sm:$0x3] }
  0x38   : > { %v4302_v49 = vcombine.low %v361_v63, %v364_v5  ;;  %v1907_v55 = vsel %vm6094_vm3, %v1905_v16, %v1906_v13  ;;  %v4527_v43 = vrot.slane %v6361_v48, 9  ;;  %v1910_v23 = vrot.slane %v6364_v41, 5  ;;  %v6374_v61 = vld [vmem:[%s6077_s29 + $0x54] sm:$0xf]  ;;  %v6380_v5 = vld [vmem:[%s6077_s29 + $0x58] sm:$0xf]  ;;  %5088 = vmatpush3.bf16.msra.mxu1 %v5739_v15 }
  0x39   : > { %8157 = vst [vmem:[#allocation8_spill] sm:$0xff] %v6374_v61  ;;  %v4550_v2 = vcombine.low %v1904_v27, %v1907_v55  ;;  %v368_v33 = vsel %vm6094_vm3, %v4279_v24, %v367_v37  ;;  %v369_v57 = vrot.slane %v367_v37, 4  ;;  %v1913_v63 = vrot.slane %v6369_v40, 5  ;;  %8158 = vst [vmem:[#allocation9_spill] sm:$0xff] %v6380_v5  ;;  %v239_v13 = vld [vmem:[%s6077_s29 + $0x5c] sm:$0x3]  ;;  %5248 = vmatpush3.bf16.msra.mxu0 %v5736_v54 }
  0x3a   : > { %5058 = vmatmul.mubr.msk.bf16.gmra.mrb[8].mxu1 %vm516_vm2, %v4302_v49  ;;  %v1911_v16 = vsel %vm6094_vm3, %v4527_v43, %v1910_v23  ;;  %v1912_v30 = vrot.slane %v1910_v23, 4  ;;  %v4280_v55 = vrot.slane %v6374_v61, 9  ;;  %v374_v27 = vrot.slane %v6380_v5, 5  ;;  %v6394_v24 = vld [vmem:[%s8095_s1 + $0xc0] sm:$0xff]   ;;  %v6399_v49 = vld [vmem:[%s6077_s29 + $0x70] sm:$0xf] }
  0x3b   : > { %v371_v54 = vsel %vm6094_vm3, %v369_v57, %v370_v38  ;;  %v377_v37 = vrot.slane %v239_v13, 5  ;;  %v6402_v43 = vld [vmem:[%s6077_s29 + $0x74] sm:$0x3]  ;;  %v4528_v23 = vrot.slane %v6389_v44, 9  ;;  %v2303_v61 = vsel %vm6314_vm6, %v4581_v28, %v8105_v29  ;;  %5281 = vmatprep.subr.bf16.mxu0 %v6394_v24  ;;  %v6447_v62 = vld [vmem:[%s6077_s29 + $0x6c] sm:$0xf] }
  0x3c   : > { %5218 = vmatmul.mubr.msk.bf16.gmra.mrb[8].mxu0 %vm516_vm2, %v4550_v2  ;;  %v4303_v57 = vcombine.low %v368_v33, %v371_v54  ;;  %v1914_v38 = vsel %vm6094_vm3, %v1912_v30, %v1913_v63  ;;  %v375_v13 = vsel %vm6094_vm3, %v4280_v55, %v374_v27  ;;  %v376_v5 = vrot.slane %v374_v27, 4  ;;  %v6423_v2 = vld [vmem:[%s6077_s29 + $0x60] sm:$0xf]  ;;  %v6426_v30 = vld [vmem:[%s6077_s29 + $0x64] sm:$0xf] }
  0x3d   : > { %v4551_v21 = vcombine.low %v1911_v16, %v1914_v38  ;;  %v1917_v28 = vrot.slane %v6399_v49, 5  ;;  %v1920_v29 = vrot.slane %v6402_v43, 5  ;;  %v8159_v33 = vrot.slane %v6138_v35, 6  ;;  %v242_v55 = vld [vmem:[%s6077_s29 + $0x68] sm:$0x3] }
  0x3e   : > { %5061 = vmatprep.mubr.msk.bf16.mxu1 %vm516_vm2, %v4303_v57  ;;  %v378_v16 = vsel %vm6094_vm3, %v376_v5, %v377_v37  ;;  %v4281_v27 = vrot.slane %v6423_v2, 9  ;;  %v381_v54 = vrot.slane %v6426_v30, 5  ;;  %v8160_v38 = vrot.slane %v6107_v18, 6  ;;  %v6450_v5 = vld [vmem:[%s6077_s29 + $0x70] sm:$0xf] }
  0x3f   : > { %v6433_v63 = vsel %vm6314_vm6, %v6168_v52, %v8159_v33  ;;  %5221 = vmatprep.mubr.msk.bf16.mxu0 %vm516_vm2, %v4551_v21  ;;  %v4304_v35 = vcombine.low %v375_v13, %v378_v16  ;;  %v1918_v52 = vsel %vm6094_vm3, %v4528_v23, %v1917_v28  ;;  %v1919_v57 = vrot.slane %v1917_v28, 4  ;;  %v245_v13 = vld [vmem:[%s6077_s29 + $0x74] sm:$0x3] }
  0x40   : > { %v2304_v17 = vrot.slane %v8160_v38, 4  ;;  %v384_v33 = vrot.slane %v242_v55, 5  ;;  %v382_v18 = vsel %vm6094_vm3, %v4281_v27, %v381_v54  ;;  %v383_v37 = vrot.slane %v381_v54, 4 }
  0x41   : > { %v8161_v38 = vrot.slane %v6110_v19, 6  ;;  %v4282_v23 = vrot.slane %v6447_v62, 9  ;;  %v1921_v28 = vsel %vm6094_vm3, %v1919_v57, %v1920_v29  ;;  %v388_v15 = vrot.slane %v6450_v5, 5  ;;  %v6478_v57 = vld [vmem:[%s6077_s29 + $0x78] sm:$0xf] }
  0x42   : > { %v391_v55 = vrot.slane %v245_v13, 5  ;;  %5062 = vmatmul.mubr.msk.bf16.gmra.mrb[12].mxu1 %vm516_vm2, %v4304_v35  ;;  %v4552_v27 = vcombine.low %v1918_v52, %v1921_v28  ;;  %v385_v19 = vsel %vm6094_vm3, %v383_v37, %v384_v33  ;;  %v8163_v54 = vrot.slane %v6154_v45, 10  ;;  %8165 = vst [vmem:[#allocation10_spill] sm:$0xff] %v6478_v57  ;;  %v6481_v35 = vld [vmem:[%s6077_s29 + $0x7c] sm:$0xf] }
  0x43   : > { %v2306_v21 = vsel %vm6314_vm6, %v2304_v17, %v8161_v38  ;;  %v8162_v17 = vrot.slane %v6157_v46, 6  ;;  %v8164_v29 = vrot.slane %v6163_v50, 6  ;;  %v4305_v52 = vcombine.low %v382_v18, %v385_v19  ;;  %v248_v33 = vld [vmem:[%s6077_s29 + $0x80] sm:$0x3]  ;;  %v6495_v28 = vld [vmem:[%s6077_s29 + $0x88] sm:$0xf] }
  0x44   : > { %v4605_v16 = vcombine.low %v2303_v61, %v2306_v21  ;;  %v389_v46 = vsel %vm6094_vm3, %v4282_v23, %v388_v15  ;;  %v390_v45 = vrot.slane %v388_v15, 4  ;;  %v4283_v37 = vrot.slane %v6478_v57, 9  ;;  %v6488_v21 = vld [vmem:[%s6077_s29 + $0x84] sm:$0xf]  ;;  %5222 = vmatmul.mubr.msk.bf16.gmra.mrb[12].mxu0 %vm516_vm2, %v4552_v27  ;;  %8167 = vst [vmem:[#allocation12_spill] sm:$0xff] %v6495_v28 }
  0x45   : > { %v2310_v38 = vsel %vm6314_vm6, %v8163_v54, %v8162_v17  ;;  %v2313_v61 = vsel %vm6314_vm6, %v6197_v4, %v8164_v29  ;;  %8166 = vst [vmem:[#allocation11_spill] sm:$0xff] %v6488_v21  ;;  %v395_v50 = vrot.slane %v6481_v35, 5  ;;  %v398_v4 = vrot.slane %v248_v33, 5  ;;  %5065 = vmatprep.mubr.msk.bf16.mxu1 %vm516_vm2, %v4305_v52  ;;  %v251_v27 = vld [vmem:[%s6077_s29 + $0x8c] sm:$0x3] }
  0x46   : > { %v4583_v13 = vrot.slane %v6193_v3, 10  ;;  %v2316_v18 = vrot.slane %v6201_v10, 6  ;;  %5249 = vmatprep.mubr.msk.bf16.mxu0 %vm516_vm2, %v4605_v16  ;;  %v392_v23 = vsel %vm6094_vm3, %v390_v45, %v391_v55  ;;  %v2319_v15 = vrot.slane %v6208_v14, 6  ;;  %v6508_v10 = vld [vmem:[%s8095_s1 + $0x40] sm:$0xff]   ;;  %v6513_v29 = vld [vmem:[%s6077_s29 + $0x90] sm:$0xf] }
  0x47   : > { %v4284_v19 = vrot.slane %v6488_v21, 9  ;;  %v402_v3 = vrot.slane %v6495_v28, 5  ;;  %v4306_v17 = vcombine.low %v389_v46, %v392_v23  ;;  %v4606_v54 = vcombine.low %v2310_v38, %v2313_v61  ;;  %v6516_v14 = vld [vmem:[%s6077_s29 + $0x94] sm:$0xf]  ;;  %v254_v28 = vld [vmem:[%s6077_s29 + $0x98] sm:$0x3]  ;;  %5121 = vmatprep.subr.bf16.mxu1 %v6508_v10 }
  0x48   : > { %v396_v16 = vsel %vm6094_vm3, %v4283_v37, %v395_v50  ;;  %v397_v55 = vrot.slane %v395_v50, 4  ;;  %v2317_v52 = vsel %vm6314_vm6, %v4583_v13, %v2316_v18  ;;  %v2318_v45 = vrot.slane %v2316_v18, 4  ;;  %v6528_v50 = vld [vmem:[%s6077_s29 + $0x9c] sm:$0xf]  ;;  %v6536_v57 = vld [vmem:[%s6077_s29 + $0xa0] sm:$0xf] }
  0x49   : > { %v404_v33 = vrot.slane %v402_v3, 4  ;;  %v405_v21 = vrot.slane %v251_v27, 5  ;;  %v4584_v61 = vrot.slane %v6230_v47, 10  ;;  %v2323_v46 = vrot.slane %v6239_v51, 6 }
  0x4a   : > { %v399_v38 = vsel %vm6094_vm3, %v397_v55, %v398_v4  ;;  %v2326_v37 = vrot.slane %v6242_v53, 6  ;;  %v2320_v13 = vsel %vm6314_vm6, %v2318_v45, %v2319_v15  ;;  %v403_v18 = vsel %vm6094_vm3, %v4284_v19, %v402_v3  ;;  %v257_v4 = vld [vmem:[%s6077_s29 + $0xa4] sm:$0x3]  ;;  %5066 = vmatmul.mubr.msk.bf16.gmra.mrb[16].mxu1 %vm516_vm2, %v4306_v17  ;;  %v5740_v15 = vld [vmem:[%s8095_s1 + $0xc8] sm:$0xff]  }
  0x4b   : > { %v4307_v23 = vcombine.low %v396_v16, %v399_v38  ;;  %v4285_v27 = vrot.slane %v6513_v29, 9  ;;  %v4607_v47 = vcombine.low %v2317_v52, %v2320_v13  ;;  %v406_v51 = vsel %vm6094_vm3, %v404_v33, %v405_v21 }
  0x4c   : > { %v2324_v53 = vsel %vm6314_vm6, %v4584_v61, %v2323_v46  ;;  %v2325_v16 = vrot.slane %v2323_v46, 4  ;;  %v409_v19 = vrot.slane %v6516_v14, 5  ;;  %v412_v3 = vrot.slane %v254_v28, 5  ;;  %5250 = vmatmul.mubr.msk.bf16.vlgmr.msra.gmra.mrb[0].mxu0 %vm516_vm2, %v4606_v54  ;;  %v6562_v54 = vld [vmem:[%s6077_s29 + $0xa8] sm:$0xf] }
  0x4d   : > { %5069 = vmatprep.mubr.msk.bf16.mxu1 %vm516_vm2, %v4307_v23  ;;  %v4585_v17 = vrot.slane %v6268_v32, 10  ;;  %v2330_v55 = vrot.slane %v6274_v39, 6  ;;  %v2333_v52 = vrot.slane %v6277_v42, 6  ;;  %v4286_v45 = vrot.slane %v6528_v50, 9  ;;  %5282 = vmatpush3.bf16.msra.mxu0 %v6394_v24  ;;  %v5744_v24 = vld [vmem:[%s8095_s1 + $0xd0] sm:$0xff]  }
  0x4e   : > { %v2327_v21 = vsel %vm6314_vm6, %v2325_v16, %v2326_v37  ;;  %v416_v33 = vrot.slane %v6536_v57, 5  ;;  %5253 = vmatprep.mubr.msk.bf16.mxu0 %vm516_vm2, %v4607_v47  ;;  %v4308_v32 = vcombine.low %v403_v18, %v406_v51  ;;  %v410_v39 = vsel %vm6094_vm3, %v4285_v27, %v409_v19  ;;  %5283 = vmatprep.subr.bf16.mxu0 %v5740_v15  ;;  %v6575_v27 = vld [vmem:[%s6077_s29 + $0xac] sm:$0xf]  ;;  %v260_v47 = vld [vmem:[%s6077_s29 + $0xb0] sm:$0x3] }
  0x4f   : > { %v411_v28 = vrot.slane %v409_v19, 4  ;;  %v2331_v42 = vsel %vm6314_vm6, %v4585_v17, %v2330_v55  ;;  %v2332_v38 = vrot.slane %v2330_v55, 4  ;;  %v419_v46 = vrot.slane %v257_v4, 5 }
  0x50   : > { %v418_v61 = vrot.slane %v416_v33, 4  ;;  %v4608_v37 = vcombine.low %v2324_v53, %v2327_v21  ;;  %v417_v13 = vsel %vm6094_vm3, %v4286_v45, %v416_v33  ;;  %v2337_v18 = vrot.slane %v6310_v58, 6  ;;  %v6583_v53 = vld [vmem:[%s6077_s29 + $0xb8] sm:$0xf] }
  0x51   : > { %v413_v23 = vsel %vm6094_vm3, %v411_v28, %v412_v3  ;;  %v2334_v4 = vsel %vm6314_vm6, %v2332_v38, %v2333_v52  ;;  %v4586_v16 = vrot.slane %v6307_v20, 10  ;;  %v4287_v19 = vrot.slane %v6562_v54, 9  ;;  %5284 = vmatpush3.bf16.msra.mxu0 %v5740_v15  ;;  %v5750_v33 = vld [vmem:[%s8095_s1 + $0xd8] sm:$0xff]   ;;  %v6598_v15 = vld [vmem:[%s6077_s29 + $0xb4] sm:$0xf] }
  0x52   : > { %v4309_v51 = vcombine.low %v410_v39, %v413_v23  ;;  %v4609_v3 = vcombine.low %v2331_v42, %v2334_v4  ;;  %v420_v17 = vsel %vm6094_vm3, %v418_v61, %v419_v46  ;;  %v2339_v55 = vrot.slane %v2337_v18, 4  ;;  %5070 = vmatmul.mubr.msk.bf16.gmra.mrb[20].mxu1 %vm516_vm2, %v4308_v32  ;;  %5285 = vmatprep.subr.bf16.mxu0 %v5744_v24  ;;  %v263_v39 = vld [vmem:[%s6077_s29 + $0xbc] sm:$0x3]  ;;  %v4453_v61 = vld [vmem:[%s6077_s29 + $0x78] sm:$0xf]  ;;  %v6614_v46 = vld [vmem:[%s8095_s1 + $0xe0] sm:$0xff]  }
  0x53   : > { %v2340_v58 = vrot.slane %v6322_v26, 6  ;;  %v423_v21 = vrot.slane %v6575_v27, 5  ;;  %v426_v52 = vrot.slane %v260_v47, 5  ;;  %v4587_v20 = vrot.slane %v6361_v48, 10  ;;  %v4454_v47 = vld [vmem:[%s6077_s29 + $0x7c] sm:$0xf] }
  0x54   : > { %v2344_v45 = vrot.slane %v6364_v41, 6  ;;  %5073 = vmatprep.mubr.msk.bf16.mxu1 %vm516_vm2, %v4309_v51  ;;  %v2347_v26 = vrot.slane %v6369_v40, 6  ;;  %v430_v32 = vrot.slane %v6583_v53, 5  ;;  %5254 = vmatmul.mubr.msk.bf16.gmra.mrb[4].mxu0 %vm516_vm2, %v4608_v37  ;;  %v4310_v28 = vcombine.low %v417_v13, %v420_v17  ;;  %v4455_v51 = vld [vmem:[%s6077_s29 + $0x80] sm:$0x3] }
  0x55   : > { %v424_v48 = vsel %vm6094_vm3, %v4287_v19, %v423_v21  ;;  %v425_v41 = vrot.slane %v423_v21, 4  ;;  %5257 = vmatprep.mubr.msk.bf16.mxu0 %vm516_vm2, %v4609_v3  ;;  %v2338_v42 = vsel %vm6314_vm6, %v4586_v16, %v2337_v18  ;;  %v2341_v40 = vsel %vm6314_vm6, %v2339_v55, %v2340_v58  ;;  %5286 = vmatpush3.bf16.msra.mxu0 %v5744_v24 }
  0x56   : > { %v2346_v38 = vrot.slane %v2344_v45, 4  ;;  %v2345_v23 = vsel %vm6314_vm6, %v4587_v20, %v2344_v45  ;;  %v4288_v13 = vrot.slane %v6598_v15, 9  ;;  %v2351_v18 = vrot.slane %v6399_v49, 6  ;;  %5287 = vmatprep.subr.bf16.mxu0 %v5750_v33  ;;  %v4457_v45 = vld [vmem:[%s6077_s29 + $0x88] sm:$0xf] }
  0x57   : > { %v427_v37 = vsel %vm6094_vm3, %v425_v41, %v426_v52  ;;  %v432_v16 = vrot.slane %v430_v32, 4  ;;  %v433_v19 = vrot.slane %v263_v39, 5  ;;  %v4610_v3 = vcombine.low %v2338_v42, %v2341_v40  ;;  %v4456_v39 = vld [vmem:[%s6077_s29 + $0x84] sm:$0xf] }
  0x58   : > { %v4311_v24 = vcombine.low %v424_v48, %v427_v37  ;;  %v2348_v4 = vsel %vm6314_vm6, %v2346_v38, %v2347_v26  ;;  %v4588_v17 = vrot.slane %v6389_v44, 10  ;;  %v2353_v58 = vrot.slane %v2351_v18, 4  ;;  %v4458_v38 = vld [vmem:[%s6077_s29 + $0x8c] sm:$0x3]  ;;  %v4459_v37 = vld [vmem:[%s6077_s29 + $0x90] sm:$0xf] }
  0x59   : > { %v4611_v55 = vcombine.low %v2345_v23, %v2348_v4  ;;  %v2354_v21 = vrot.slane %v6402_v43, 6  ;;  %v2358_v52 = vrot.slane %v4454_v47, 6  ;;  %5288 = vmatpush3.bf16.msra.mxu0 %v5750_v33  ;;  %v4589_v49 = vrot.slane %v4453_v61, 10  ;;  %v4460_v33 = vld [vmem:[%s6077_s29 + $0x94] sm:$0xf] }
  0x5a   : > { %5074 = vmatmul.mubr.msk.bf16.gmra.mrb[24].mxu1 %vm516_vm2, %v4310_v28  ;;  %v2361_v20 = vrot.slane %v4455_v51, 6  ;;  %5321 = vmatprep.subr.bf16.mxu0 %v6614_v46  ;;  %v431_v44 = vsel %vm6094_vm3, %v4288_v13, %v430_v32  ;;  %v434_v43 = vsel %vm6094_vm3, %v432_v16, %v433_v19  ;;  %v2352_v48 = vsel %vm6314_vm6, %v4588_v17, %v2351_v18  ;;  %v4461_v23 = vld [vmem:[%s6077_s29 + $0x98] sm:$0x3]  ;;  %v4463_v4 = vld [vmem:[%s6077_s29 + $0xa0] sm:$0xf] }
  0x5b   : > { %5077 = vmatprep.mubr.msk.bf16.mxu1 %vm516_vm2, %v4311_v24  ;;  %v2360_v26 = vrot.slane %v2358_v52, 4  ;;  %v2355_v41 = vsel %vm6314_vm6, %v2353_v58, %v2354_v21  ;;  %v2365_v28 = vrot.slane %v4457_v45, 6  ;;  %v4312_v32 = vcombine.low %v431_v44, %v434_v43  ;;  %v4464_v45 = vld [vmem:[%s6077_s29 + $0xa4] sm:$0x3]  ;;  %v4465_v44 = vld [vmem:[%s6077_s29 + $0xa8] sm:$0xf] }
  0x5c   : > { %5258 = vmatmul.mubr.msk.bf16.gmra.mrb[8].mxu0 %vm516_vm2, %v4610_v3  ;;  %v2359_v42 = vsel %vm6314_vm6, %v4589_v49, %v2358_v52  ;;  %v2372_v61 = vrot.slane %v4460_v33, 6  ;;  %v4612_v13 = vcombine.low %v2352_v48, %v2355_v41  ;;  %v4590_v18 = vrot.slane %v4456_v39, 10  ;;  %v4462_v52 = vld [vmem:[%s6077_s29 + $0x9c] sm:$0xf]  ;;  %v4467_v33 = vld [vmem:[%s6077_s29 + $0xb0] sm:$0x3] }
  0x5d   : > { %5261 = vmatprep.mubr.msk.bf16.mxu0 %vm516_vm2, %v4611_v55  ;;  %v2362_v40 = vsel %vm6314_vm6, %v2360_v26, %v2361_v20  ;;  %v2367_v51 = vrot.slane %v2365_v28, 4  ;;  %v2368_v24 = vrot.slane %v4458_v38, 6  ;;  %v4591_v16 = vrot.slane %v4459_v37, 10  ;;  %v4466_v55 = vld [vmem:[%s6077_s29 + $0xac] sm:$0xf] }
  0x5e   : > { %v4613_v47 = vcombine.low %v2359_v42, %v2362_v40  ;;  %v2374_v19 = vrot.slane %v2372_v61, 4  ;;  %v2375_v3 = vrot.slane %v4461_v23, 6  ;;  %v8168_v17 = vcombine.low %v6083_v7, %v6086_v8  ;;  %v5749_v39 = vld [vmem:[%s8095_s1 + $0x48] sm:$0xff]   ;;  %v4469_v38 = vld [vmem:[%s6077_s29 + $0xb8] sm:$0xf]  ;;  %v5756_v23 = vld [vmem:[%s8095_s1 + $0x50] sm:$0xff]  }
  0x5f   : > { %v2366_v58 = vsel %vm6314_vm6, %v4590_v18, %v2365_v28  ;;  %v2369_v21 = vsel %vm6314_vm6, %v2367_v51, %v2368_v24  ;;  %v2379_v49 = vrot.slane %v4463_v4, 6  ;;  %v2373_v20 = vsel %vm6314_vm6, %v4591_v16, %v2372_v61  ;;  %v4470_v24 = vld [vmem:[%s6077_s29 + $0xbc] sm:$0x3]  ;;  %v4471_v4 = vld [vmem:[%s6077_s29 + $0xc0] sm:$0xf] }
  0x60   : > { %v2376_v7 = vsel %vm6314_vm6, %v2374_v19, %v2375_v3  ;;  %v2386_v43 = vrot.slane %v4466_v55, 6  ;;  %v4335_v26 = vcombine.low %v6181_v59, %v6184_v60  ;;  %v4614_v48 = vcombine.low %v2366_v58, %v2369_v21  ;;  %v4472_v60 = vld [vmem:[%s6077_s29 + $0xc4] sm:$0xf]  ;;  %v4473_v3 = vld [vmem:[%s6077_s29 + $0xc8] sm:$0x3] }
  0x61   : > { %v4592_v41 = vrot.slane %v4462_v52, 10  ;;  %v4615_v28 = vcombine.low %v2373_v20, %v2376_v7  ;;  %v2382_v42 = vrot.slane %v4464_v45, 6  ;;  %v4593_v40 = vrot.slane %v4465_v44, 10  ;;  %v4475_v7 = vld [vmem:[%s6077_s29 + $0xd0] sm:$0xf] }
  0x62   : > { %5078 = vmatmul.mubr.msk.bf16.gmra.mrb[28].mxu1 %vm516_vm2, %v4312_v32  ;;  %v2381_v32 = vrot.slane %v2379_v49, 4  ;;  %v8169_v61 = vcombine.low %v6119_v25, %v6131_v31  ;;  %v2388_v37 = vrot.slane %v2386_v43, 4  ;;  %v2389_v59 = vrot.slane %v4467_v33, 6 }
  0x63   : > { %5089 = vmatprep.mubr.msk.bf16.mxu1 %vm516_vm2, %v8168_v17  ;;  %v2380_v25 = vsel %vm6314_vm6, %v4592_v41, %v2379_v49  ;;  %v4336_v18 = vcombine.low %v6212_v22, %v6222_v34  ;;  %v2400_v16 = vrot.slane %v4472_v60, 6  ;;  %v4337_v19 = vcombine.low %v6256_v6, %v6259_v12  ;;  %v5766_v22 = vld [vmem:[%s8095_s1 + $0x58] sm:$0xff]   ;;  %v8171_v41 = vld [vmem:[#allocation5_spill] sm:$0xff] }
  0x64   : > { %5262 = vmatmul.mubr.msk.bf16.gmra.mrb[12].mxu0 %vm516_vm2, %v4612_v13  ;;  %v2383_v31 = vsel %vm6314_vm6, %v2381_v32, %v2382_v42  ;;  %v2393_v13 = vrot.slane %v4469_v38, 6  ;;  %v2390_v51 = vsel %vm6314_vm6, %v2388_v37, %v2389_v59  ;;  %v1015_v17 = vrot.slane %v6089_v9, 6  ;;  %v4474_v42 = vld [vmem:[%s6077_s29 + $0xcc] sm:$0xf]  ;;  %v8172_v38 = vld [vmem:[#allocation7_spill] sm:$0xff] }
  0x65   : > { %5265 = vmatprep.mubr.msk.bf16.mxu0 %vm516_vm2, %v4613_v47  ;;  %v2387_v47 = vsel %vm6314_vm6, %v4593_v40, %v2386_v43  ;;  %v4616_v55 = vcombine.low %v2380_v25, %v2383_v31  ;;  %v4394_v34 = vcombine.low %v6354_v1, %v6433_v63  ;;  %v2396_v49 = vrot.slane %v4470_v24, 6  ;;  %v6725_v43 = vld [vmem:[%s8095_s1 + $0x60] sm:$0xff]   ;;  %v4476_v40 = vld [vmem:[%s6077_s29 + $0xd4] sm:$0x3] }
  0x66   : > { %v4617_v58 = vcombine.low %v2387_v47, %v2390_v51  ;;  %v2395_v52 = vrot.slane %v2393_v13, 4  ;;  %v4595_v6 = vrot.slane %v4471_v4, 10  ;;  %v2402_v12 = vrot.slane %v2400_v16, 4  ;;  %v6756_v51 = vld [vmem:[%s6077_s29 + $0x30] sm:$0xf] }
  0x67   : > { %v2403_v20 = vrot.slane %v4473_v3, 6  ;;  %v8170_v9 = vrot.slane %v6086_v8, 6  ;;  %v2407_v33 = vrot.slane %v4475_v7, 6  ;;  %v2410_v25 = vrot.slane %v4476_v40, 6  ;;  %v6759_v24 = vld [vmem:[%s6077_s29 + $0x34] sm:$0xf] }
  0x68   : > { %v4341_v4 = vcombine.low %v6423_v2, %v6426_v30  ;;  %v6770_v3 = vld [vmem:[%s6077_s29 + $0x3c] sm:$0xf]  ;;  %v6776_v2 = vld [vmem:[%s6077_s29 + $0x48] sm:$0xf]  ;;  %v4342_v30 = vcombine.low %v6447_v62, %v6450_v5  ;;  %v6798_v62 = vld [vmem:[%s6077_s29 + $0x54] sm:$0xf] }
  0x69   : > { %v1014_v45 = vrot.slane %v8170_v9, 4  ;;  %v2404_v32 = vsel %vm6314_vm6, %v2402_v12, %v2403_v20  ;;  %v6801_v5 = vld [vmem:[%s6077_s29 + $0x58] sm:$0xf]  ;;  %v6806_v20 = vld [vmem:[%s6077_s29 + $0x60] sm:$0xf]  ;;  %v5776_v9 = vld [vmem:[%s8095_s1 + $0xf0] sm:$0xff]  }
  0x6a   : > { %5090 = vmatmul.mubr.msk.bf16.vlgmr.msra.gmra.mrb[0].mxu1 %vm516_vm2, %v8169_v61  ;;  %v8173_v61 = vld [vmem:[#allocation6_spill] sm:$0xff]  ;;  %v6809_v7 = vld [vmem:[%s6077_s29 + $0x64] sm:$0xf]  ;;  %v4735_v40 = vrot.slane %v6776_v2, 9 }
  0x6b   : > { %5122 = vmatpush3.bf16.msra.mxu1 %v6508_v10  ;;  %5093 = vmatprep.mubr.msk.bf16.mxu1 %vm516_vm2, %v4335_v26  ;;  %v4468_v10 = vld [vmem:[%s6077_s29 + $0xb4] sm:$0xf]  ;;  %v6720_v44 = vsel %vm6314_vm6, %v1014_v45, %v1015_v17  ;;  %v2397_v26 = vsel %vm6314_vm6, %v2395_v52, %v2396_v49  ;;  %v4339_v37 = vcombine.low %v8173_v61, %v8172_v38  ;;  %v6773_v17 = vld [vmem:[%s6077_s29 + $0x40] sm:$0xf]  ;;  %v5768_v49 = vld [vmem:[%s8095_s1 + $0xe8] sm:$0xff]  }
  0x6c   : > { %5266 = vmatmul.mubr.msk.bf16.gmra.mrb[16].mxu0 %vm516_vm2, %v4614_v48  ;;  %5123 = vmatprep.subr.bf16.mxu1 %v5749_v39  ;;  %v4594_v21 = vrot.slane %v4468_v10, 10  ;;  %v4393_v48 = vcombine.low %v6332_v56, %v6720_v44  ;;  %v4700_v45 = vcombine.low %v6798_v62, %v6801_v5  ;;  %v6838_v61 = vld [vmem:[%s8095_s1 + $0x100] sm:$0xff]  }
  0x6d   : > { %5269 = vmatprep.mubr.msk.bf16.mxu0 %vm516_vm2, %v4615_v28  ;;  %v2401_v28 = vsel %vm6314_vm6, %v4595_v6, %v2400_v16  ;;  %v8178_v6 = vld [vmem:[#allocation11_spill] sm:$0xff]  ;;  %8179 = vst [vmem:[#allocation5_spill] sm:$0xff] %v6838_v61  ;;  %v6997_v44 = vld [vmem:[%s6077_s29 + $0xc4] sm:$0xf] }
  0x6e   : > { %v2394_v8 = vsel %vm6314_vm6, %v4594_v21, %v2393_v13  ;;  %v4619_v60 = vcombine.low %v2401_v28, %v2404_v32  ;;  %v8174_v13 = vld [vmem:[#allocation9_spill] sm:$0xff]  ;;  %v4698_v21 = vcombine.low %v6770_v3, %v6773_v17  ;;  %v8112_v28 = vrot.slane %v6773_v17, 5 }
  0x6f   : > { %5124 = vmatpush3.bf16.msra.mxu1 %v5749_v39  ;;  %v4338_v39 = vcombine.low %v8171_v41, %v6294_v0  ;;  %v4618_v59 = vcombine.low %v2394_v8, %v2397_v26  ;;  %v2409_v0 = vrot.slane %v2407_v33, 4  ;;  %v4701_v8 = vcombine.low %v6806_v20, %v6809_v7 }
  0x70   : > { %5125 = vmatprep.subr.bf16.mxu1 %v5756_v23  ;;  %v4733_v26 = vrot.slane %v6756_v51, 9 }
  0x71   : > { %v2411_v10 = vsel %vm6314_vm6, %v2409_v0, %v2410_v25  ;;  %v4736_v25 = vrot.slane %v6798_v62, 9 }
  0x72   : > { %5094 = vmatmul.mubr.msk.bf16.gmra.mrb[4].mxu1 %vm516_vm2, %v4336_v18  ;;  %v8175_v18 = vld [vmem:[#allocation8_spill] sm:$0xff] }
  0x73   : > { %5097 = vmatprep.mubr.msk.bf16.mxu1 %vm516_vm2, %v4337_v19  ;;  %5126 = vmatpush3.bf16.msra.mxu1 %v5756_v23  ;;  %v4596_v23 = vrot.slane %v4474_v42, 10  ;;  %v4340_v47 = vcombine.low %v8175_v18, %v8174_v13  ;;  %v4697_v19 = vcombine.low %v6756_v51, %v6759_v24  ;;  %v6857_v18 = vld [vmem:[%s6077_s29 + $0x7c] sm:$0xf]  ;;  %v7005_v42 = vld [vmem:[%s6077_s29 + $0xcc] sm:$0xf] }
  0x74   : > { %5270 = vmatmul.mubr.msk.bf16.gmra.mrb[20].mxu0 %vm516_vm2, %v4616_v55  ;;  %5127 = vmatprep.subr.bf16.mxu1 %v5766_v22  ;;  %v6781_v55 = vld [vmem:[%s6077_s29 + $0x4c] sm:$0xf] }
  0x75   : > { %5273 = vmatprep.mubr.msk.bf16.mxu0 %vm516_vm2, %v4617_v58  ;;  %v2408_v31 = vsel %vm6314_vm6, %v4596_v23, %v2407_v33  ;;  %v4699_v52 = vcombine.low %v6776_v2, %v6781_v55  ;;  %v5782_v33 = vld [vmem:[%s8095_s1 + $0xf8] sm:$0xff]   ;;  %v6847_v23 = vld [vmem:[%s6077_s29 + $0x70] sm:$0xf] }
  0x76   : > { %v4620_v16 = vcombine.low %v2408_v31, %v2411_v10  ;;  %v4346_v31 = vcombine.low %v6528_v50, %v6536_v57  ;;  %v6854_v10 = vld [vmem:[%s6077_s29 + $0x78] sm:$0xf]  ;;  %v5812_v57 = vld [vmem:[%s6077_s29 + $0x34] sm:$0xf] }
  0x77   : > { %5128 = vmatpush3.bf16.msra.mxu1 %v5766_v22  ;;  %v8176_v22 = vld [vmem:[#allocation10_spill] sm:$0xff] }
  0x78   : > { %5161 = vmatprep.subr.bf16.mxu1 %v6725_v43  ;;  %v4343_v58 = vcombine.low %v8176_v22, %v6481_v35  ;;  %v8177_v35 = vld [vmem:[#allocation12_spill] sm:$0xff]  ;;  %v8115_v22 = vrot.slane %v6809_v7, 5 }
  0x79   : > { %v4344_v12 = vcombine.low %v8178_v6, %v8177_v35  ;;  %v5807_v6 = vld [vmem:[%s6077_s29 + $0x1c] sm:$0xf] }
  0x7a   : > { %5098 = vmatmul.mubr.msk.bf16.gmra.mrb[8].mxu1 %vm516_vm2, %v4338_v39  ;;  %v4734_v39 = vrot.slane %v6770_v3, 9 }
  0x7b   : > { %5101 = vmatprep.mubr.msk.bf16.mxu1 %vm516_vm2, %v4339_v37  ;;  %v8113_v37 = vrot.slane %v6781_v55, 5 }
  0x7c   : > { %5274 = vmatmul.mubr.msk.bf16.gmra.mrb[24].mxu0 %vm516_vm2, %v4618_v59  ;;  %v6910_v35 = vsel %vm6094_vm3, %v4734_v39, %v8112_v28  ;;  %v5809_v39 = vld [vmem:[%s6077_s29 + $0x18] sm:$0xf]  ;;  %v5814_v59 = vld [vmem:[%s6077_s29 + $0x40] sm:$0xf] }
  0x7d   : > { %5277 = vmatprep.mubr.msk.bf16.mxu0 %vm516_vm2, %v4619_v60  ;;  %v6844_v60 = vld [vmem:[%s6077_s29 + $0x6c] sm:$0xf]  ;;  %8180 = vst [vmem:[#allocation7_spill] sm:$0xff] %v6910_v35  ;;  %v4371_v28 = vrot.slane %v5809_v39, 10  ;;  %v1047_v0 = vrot.slane %v5814_v59, 6 }
  0x7e   : > { %v4702_v50 = vcombine.low %v6844_v60, %v6847_v23  ;;  %v7165_v35 = vld [vmem:[%s6077_s29 + $0x5c] sm:$0x3] }
  0x82   : > { %5102 = vmatmul.mubr.msk.bf16.gmra.mrb[12].mxu1 %vm516_vm2, %v4340_v47  ;;  %v8114_v47 = vrot.slane %v6801_v5, 5 }
  0x83   : > { %5105 = vmatprep.mubr.msk.bf16.mxu1 %vm516_vm2, %v4341_v4  ;;  %v5813_v4 = vld [vmem:[%s6077_s29 + $0x2c] sm:$0x3] }
  0x84   : > { %5278 = vmatmul.mubr.msk.bf16.gmra.mrb[28].mxu0 %vm516_vm2, %v4620_v16  ;;  %v1036_v16 = vrot.slane %v5813_v4, 6 }
  0x85   : > { %5289 = vmatprep.mubr.msk.bf16.mxu0 %vm516_vm2, %v4697_v19  ;;  %v4347_v19 = vcombine.low %v6562_v54, %v6575_v27  ;;  %v4703_v54 = vcombine.low %v6854_v10, %v6857_v18  ;;  %v5811_v27 = vld [vmem:[%s6077_s29 + $0x24] sm:$0xf] }
  0x8a   : > { %5106 = vmatmul.mubr.msk.bf16.gmra.mrb[16].mxu1 %vm516_vm2, %v4342_v30  ;;  %v4737_v30 = vrot.slane %v6806_v20, 9 }
  0x8b   : > { %5109 = vmatprep.mubr.msk.bf16.mxu1 %vm516_vm2, %v4343_v58  ;;  %v1040_v58 = vrot.slane %v5812_v57, 6  ;;  %v6989_v57 = vld [vmem:[%s6077_s29 + $0xc0] sm:$0xf] }
  0x8c   : > { %5290 = vmatmul.mubr.msk.bf16.vlgmr.msra.gmra.mrb[0].mxu0 %vm516_vm2, %v4698_v21 }
  0x8d   : > { %5322 = vmatpush3.bf16.msra.mxu0 %v6614_v46  ;;  %5293 = vmatprep.mubr.msk.bf16.mxu0 %vm516_vm2, %v4699_v52  ;;  %v4345_v46 = vcombine.low %v6513_v29, %v6516_v14  ;;  %v8116_v29 = vrot.slane %v6759_v24, 5  ;;  %v6941_v52 = vld [vmem:[%s6077_s29 + $0xa8] sm:$0xf] }
  0x8e   : > { %5323 = vmatprep.subr.bf16.mxu0 %v5768_v49 }
  0x91   : > { %5324 = vmatpush3.bf16.msra.mxu0 %v5768_v49  ;;  %v4372_v49 = vrot.slane %v5811_v27, 10 }
  0x92   : > { %5110 = vmatmul.mubr.msk.bf16.gmra.mrb[20].mxu1 %vm516_vm2, %v4344_v12  ;;  %5325 = vmatprep.subr.bf16.mxu0 %v5776_v9  ;;  %v1026_v12 = vrot.slane %v5807_v6, 6  ;;  %v6900_v6 = vld [vmem:[%s6077_s29 + $0x90] sm:$0xf] }
  0x93   : > { %5113 = vmatprep.mubr.msk.bf16.mxu1 %vm516_vm2, %v4345_v46 }
  0x94   : > { %5294 = vmatmul.mubr.msk.bf16.gmra.mrb[4].mxu0 %vm516_vm2, %v4700_v45  ;;  %v4348_v45 = vcombine.low %v6598_v15, %v6583_v53  ;;  %v6903_v53 = vld [vmem:[%s6077_s29 + $0x94] sm:$0xf]  ;;  %v5808_v15 = vld [vmem:[%s6077_s29 + $0x28] sm:$0xf] }
  0x95   : > { %5297 = vmatprep.mubr.msk.bf16.mxu0 %vm516_vm2, %v4701_v8  ;;  %5326 = vmatpush3.bf16.msra.mxu0 %v5776_v9  ;;  %v6886_v8 = vld [vmem:[%s6077_s29 + $0x84] sm:$0xf]  ;;  %v1033_v21 = vrot.slane %v5808_v15, 6  ;;  %v6926_v9 = vld [vmem:[%s6077_s29 + $0x9c] sm:$0xf]  ;;  %v6936_v15 = vsel %vm6094_vm3, %v4736_v25, %v8114_v47  ;;  %v4705_v39 = vcombine.low %v6900_v6, %v6903_v53 }
  0x96   : > { %5327 = vmatprep.subr.bf16.mxu0 %v5782_v33  ;;  %8182 = vst [vmem:[#allocation9_spill] sm:$0xff] %v6936_v15  ;;  %v7134_v15 = vld [vmem:[%s6077_s29 + $0x68] sm:$0x3] }
  0x97   : > { %v1035_v47 = vrot.slane %v1033_v21, 4 }
  0x99   : > { %5328 = vmatpush3.bf16.msra.mxu0 %v5782_v33  ;;  %v6889_v33 = vld [vmem:[%s6077_s29 + $0x88] sm:$0xf]  ;;  %v6994_v56 = vsel %vm6314_vm6, %v1035_v47, %v1036_v16  ;;  %v5820_v47 = vld [vmem:[%s6077_s29 + $0x50] sm:$0x3] }
  0x9a   : > { %5114 = vmatmul.mubr.msk.bf16.gmra.mrb[24].mxu1 %vm516_vm2, %v4346_v31  ;;  %5361 = vmatprep.subr.bf16.mxu0 %v6838_v61  ;;  %v6895_v31 = vsel %vm6094_vm3, %v4733_v26, %v8116_v29  ;;  %v6916_v26 = vsel %vm6094_vm3, %v4735_v40, %v8113_v37  ;;  %v6929_v40 = vld [vmem:[%s6077_s29 + $0xa0] sm:$0xf]  ;;  %v1028_v37 = vrot.slane %v1026_v12, 4  ;;  %v6973_v29 = vld [vmem:[%s6077_s29 + $0xb4] sm:$0xf]  ;;  %v1057_v16 = vrot.slane %v5820_v47, 6 }
  0x9b   : > { %5117 = vmatprep.mubr.msk.bf16.mxu1 %vm516_vm2, %v4347_v19  ;;  %8181 = vst [vmem:[#allocation6_spill] sm:$0xff] %v6916_v26  ;;  %v4704_v19 = vcombine.low %v6886_v8, %v6889_v33  ;;  %v7140_v61 = vld [vmem:[%s6077_s29 + $0x50] sm:$0x3] }
  0x9c   : > { %5298 = vmatmul.mubr.msk.bf16.gmra.mrb[8].mxu0 %vm516_vm2, %v4702_v50  ;;  %v6944_v50 = vld [vmem:[%s6077_s29 + $0xac] sm:$0xf] }
  0x9d   : > { %5301 = vmatprep.mubr.msk.bf16.mxu0 %vm516_vm2, %v4703_v54  ;;  %v5810_v54 = vld [vmem:[%s6077_s29 + $0x20] sm:$0x3] }
  0x9e   : > { %v1029_v46 = vrot.slane %v5810_v54, 6  ;;  %v6952_v54 = vsel %vm6094_vm3, %v4737_v30, %v8115_v22  ;;  %v6962_v30 = vsel %vm6314_vm6, %v4371_v28, %v1026_v12  ;;  %v1054_v22 = vrot.slane %v8172_v38, 6  ;;  %v6976_v28 = vld [vmem:[%s6077_s29 + $0xb8] sm:$0xf] }
  0x9f   : > { %8183 = vst [vmem:[#allocation8_spill] sm:$0xff] %v6952_v54  ;;  %v6984_v38 = vsel %vm6314_vm6, %v4372_v49, %v1033_v21  ;;  %v1049_v49 = vrot.slane %v1047_v0, 4  ;;  %v8191_v54 = vrot.slane %v6773_v17, 6 }
  0xa0   : > { %v1030_v4 = vsel %vm6314_vm6, %v1028_v37, %v1029_v46  ;;  %v5815_v37 = vld [vmem:[%s6077_s29 + $0x30] sm:$0xf]  ;;  %v1042_v46 = vrot.slane %v1040_v58, 4  ;;  %v1056_v41 = vrot.slane %v1054_v22, 4 }
  0xa1   : > { %v4373_v12 = vrot.slane %v5815_v37, 10  ;;  %v5818_v37 = vld [vmem:[%s6077_s29 + $0x44] sm:$0x3] }
  0xa2   : > { %5118 = vmatmul.mubr.msk.bf16.gmra.mrb[28].mxu1 %vm516_vm2, %v4348_v45  ;;  %v5816_v45 = vld [vmem:[%s6077_s29 + $0x38] sm:$0x3]  ;;  %v1050_v32 = vrot.slane %v5818_v37, 6 }
  0xa3   : > { %5129 = vmatprep.mubr.msk.bf16.mxu1 %vm516_vm2, %v4393_v48  ;;  %v1043_v25 = vrot.slane %v5816_v45, 6  ;;  %v5817_v48 = vld [vmem:[%s6077_s29 + $0x3c] sm:$0xf]  ;;  %v1061_v45 = vrot.slane %v8174_v13, 6  ;;  %v5780_v13 = vld [vmem:[%s8095_s1 + $0x68] sm:$0xff]  }
  0xa4   : > { %5302 = vmatmul.mubr.msk.bf16.gmra.mrb[12].mxu0 %vm516_vm2, %v4704_v19  ;;  %v4374_v21 = vrot.slane %v5817_v48, 10  ;;  %v5819_v19 = vld [vmem:[%s6077_s29 + $0x48] sm:$0xf]  ;;  %v4395_v48 = vcombine.low %v6962_v30, %v1030_v4 }
  0xa5   : > { %5305 = vmatprep.mubr.msk.bf16.mxu0 %vm516_vm2, %v4705_v39  ;;  %v4375_v14 = vrot.slane %v5819_v19, 10  ;;  %v7013_v39 = vld [vmem:[%s6077_s29 + $0xd0] sm:$0xf]  ;;  %v7020_v19 = vsel %vm6314_vm6, %v4373_v12, %v1040_v58  ;;  %v7024_v30 = vsel %vm6314_vm6, %v1042_v46, %v1043_v25  ;;  %v7038_v58 = vsel %vm6314_vm6, %v1049_v49, %v1050_v32  ;;  %v7041_v25 = vld [vmem:[%s6077_s29 + $0xd8] sm:$0xf] }
  0xa6   : > { %v7034_v59 = vsel %vm6314_vm6, %v4374_v21, %v1047_v0  ;;  %v7044_v12 = vld [vmem:[%s6077_s29 + $0xdc] sm:$0xf]  ;;  %v5821_v46 = vld [vmem:[%s6077_s29 + $0x54] sm:$0xf]  ;;  %v7056_v21 = vsel %vm6314_vm6, %v1056_v41, %v1057_v16  ;;  %v7059_v32 = vld [vmem:[%s6077_s29 + $0xe4] sm:$0xf]  ;;  %v8185_v16 = vcombine.low %v6926_v9, %v6929_v40 }
  0xa7   : > { %v4376_v37 = vrot.slane %v5821_v46, 10  ;;  %v7052_v0 = vsel %vm6314_vm6, %v4375_v14, %v1054_v22  ;;  %8184 = vst [vmem:[#allocation10_spill] sm:$0xff] %v7059_v32  ;;  %v7062_v49 = vld [vmem:[%s6077_s29 + $0xe8] sm:$0xf]  ;;  %v4397_v46 = vcombine.low %v7020_v19, %v7024_v30  ;;  %v1063_v14 = vrot.slane %v1061_v45, 4 }
  0xa8   : > { %v5822_v22 = vld [vmem:[%s6077_s29 + $0x5c] sm:$0x3] }
  0xa9   : > { %v1064_v47 = vrot.slane %v5822_v22, 6  ;;  %v7089_v19 = vsel %vm6314_vm6, %v4376_v37, %v1061_v45  ;;  %v7094_v22 = vld [vmem:[%s6077_s29 + $0x38] sm:$0x3]  ;;  %v8187_v45 = vrot.slane %v6759_v24, 6  ;;  %v8188_v37 = vrot.slane %v6756_v51, 10 }
  0xaa   : > { %5130 = vmatmul.mubr.msk.bf16.vlgmr.msra.gmra.mrb[0].mxu1 %vm516_vm2, %v4394_v34  ;;  %v8186_v34 = vcombine.low %v6941_v52, %v6944_v50  ;;  %v8192_v51 = vrot.slane %v6770_v3, 10  ;;  %v3161_v26 = vrot.slane %v7094_v22, 5 }
  0xab   : > { %5162 = vmatpush3.bf16.msra.mxu1 %v6725_v43  ;;  %5133 = vmatprep.mubr.msk.bf16.mxu1 %vm516_vm2, %v4395_v48  ;;  %v5823_v48 = vld [vmem:[%s6077_s29 + $0x60] sm:$0xf]  ;;  %v7110_v1 = vsel %vm6314_vm6, %v8188_v37, %v8187_v45  ;;  %v8190_v30 = vmov %v8187_v45  ;;  %v3595_v43 = vrot.slane %v7094_v22, 6  ;;  %v7117_v41 = vsel %vm6314_vm6, %v1063_v14, %v1064_v47 }
  0xac   : > { %5306 = vmatmul.mubr.msk.bf16.gmra.mrb[16].mxu0 %vm516_vm2, %v8185_v16  ;;  %5163 = vmatprep.subr.bf16.mxu1 %v5780_v13  ;;  %v5785_v16 = vld [vmem:[%s8095_s1 + $0x70] sm:$0xff]   ;;  %v4377_v4 = vrot.slane %v5823_v48, 10  ;;  %8189 = vst [vmem:[#allocation12_spill] sm:$0xff] %v7110_v1  ;;  %v3594_v63 = vrot.slane %v8190_v30, 4  ;;  %v7121_v48 = vld [vmem:[%s6077_s29 + $0x44] sm:$0x3]  ;;  %v7129_v45 = vsel %vm6314_vm6, %v8192_v51, %v8191_v54  ;;  %v8194_v30 = vmov %v8191_v54 }
  0xad   : > { %5309 = vmatprep.mubr.msk.bf16.mxu0 %vm516_vm2, %v8186_v34  ;;  %v5824_v34 = vld [vmem:[%s6077_s29 + $0x64] sm:$0xf]  ;;  %8193 = vst [vmem:[#allocation11_spill] sm:$0xff] %v7129_v45  ;;  %v3601_v37 = vrot.slane %v8194_v30, 4  ;;  %v8195_v14 = vrot.slane %v6759_v24, 5  ;;  %v3602_v54 = vrot.slane %v7121_v48, 6  ;;  %v8206_v22 = vcombine.low %v6984_v38, %v6994_v56 }
  0xae   : > { %v1068_v27 = vrot.slane %v5824_v34, 6  ;;  %v7144_v3 = vsel %vm6314_vm6, %v3594_v63, %v3595_v43  ;;  %v8197_v24 = vrot.slane %v6781_v55, 6  ;;  %v8198_v30 = vrot.slane %v6776_v2, 10  ;;  %v7304_v45 = vld [vmem:[%s6077_s29 + $0x98] sm:$0x3] }
  0xaf   : > { %5164 = vmatpush3.bf16.msra.mxu1 %v5780_v13  ;;  %v3160_v34 = vrot.slane %v8195_v14, 4  ;;  %8196 = vst [vmem:[#allocation13_spill] sm:$0xff] %v7144_v3  ;;  %v5787_v13 = vld [vmem:[%s8095_s1 + $0x78] sm:$0xff]   ;;  %v3609_v47 = vrot.slane %v7140_v61, 6  ;;  %v7169_v51 = vsel %vm6314_vm6, %v3601_v37, %v3602_v54  ;;  %v8202_v3 = vrot.slane %v6801_v5, 6 }
  0xb0   : > { %5165 = vmatprep.subr.bf16.mxu1 %v5785_v16  ;;  %v7158_v14 = vsel %vm6314_vm6, %v8198_v30, %v8197_v24  ;;  %v8200_v63 = vmov %v8197_v24  ;;  %8201 = vst [vmem:[#allocation15_spill] sm:$0xff] %v7169_v51  ;;  %v8203_v2 = vrot.slane %v6798_v62, 10  ;;  %v7188_v54 = vld [vmem:[%s6077_s29 + $0x68] sm:$0x3]  ;;  %v8208_v56 = vrot.slane %v6809_v7, 6 }
  0xb1   : > { %8199 = vst [vmem:[#allocation14_spill] sm:$0xff] %v7158_v14  ;;  %v3608_v43 = vrot.slane %v8200_v63, 4  ;;  %v8205_v30 = vmov %v8202_v3  ;;  %v3623_v62 = vrot.slane %v7188_v54, 6  ;;  %v8218_v37 = vcombine.low %v6989_v57, %v6997_v44 }
  0xb2   : > { %v7177_v24 = vsel %vm6314_vm6, %v8203_v2, %v8202_v3  ;;  %v3615_v63 = vrot.slane %v8205_v30, 4  ;;  %5134 = vmatmul.mubr.msk.bf16.gmra.mrb[4].mxu1 %vm516_vm2, %v8206_v22  ;;  %v3616_v2 = vrot.slane %v7165_v35, 6  ;;  %v8209_v30 = vrot.slane %v6806_v20, 10  ;;  %v7220_v20 = vld [vmem:[%s6077_s29 + $0x74] sm:$0x3] }
  0xb3   : > { %8204 = vst [vmem:[#allocation16_spill] sm:$0xff] %v7177_v24  ;;  %v7194_v3 = vsel %vm6314_vm6, %v3608_v43, %v3609_v47  ;;  %5137 = vmatprep.mubr.msk.bf16.mxu1 %vm516_vm2, %v4397_v46  ;;  %5166 = vmatpush3.bf16.msra.mxu1 %v5785_v16  ;;  %v8211_v47 = vmov %v8208_v56  ;;  %v8212_v46 = vcombine.low %v6973_v29, %v6976_v28  ;;  %v8221_v51 = vrot.slane %v6854_v10, 10 }
  0xb4   : > { %8207 = vst [vmem:[#allocation17_spill] sm:$0xff] %v7194_v3  ;;  %v7206_v22 = vsel %vm6314_vm6, %v8209_v30, %v8208_v56  ;;  %v3622_v43 = vrot.slane %v8211_v47, 4  ;;  %v7217_v16 = vsel %vm6314_vm6, %v4377_v4, %v1068_v27  ;;  %5167 = vmatprep.subr.bf16.mxu1 %v5787_v13  ;;  %v7224_v56 = vsel %vm6314_vm6, %v3615_v63, %v3616_v2  ;;  %v7241_v63 = vld [vmem:[%s6077_s29 + $0x80] sm:$0x3] }
  0xb5   : > { %8210 = vst [vmem:[#allocation18_spill] sm:$0xff] %v7206_v22  ;;  %5310 = vmatmul.mubr.msk.bf16.gmra.mrb[20].mxu0 %vm516_vm2, %v8212_v46  ;;  %8213 = vst [vmem:[#allocation19_spill] sm:$0xff] %v7224_v56  ;;  %v8214_v30 = vrot.slane %v6847_v23, 6  ;;  %v8215_v47 = vrot.slane %v6844_v60, 10  ;;  %v1070_v3 = vrot.slane %v1068_v27, 4 }
  0xb6   : > { %5313 = vmatprep.mubr.msk.bf16.mxu0 %vm516_vm2, %v8218_v37  ;;  %v7247_v14 = vsel %vm6314_vm6, %v3622_v43, %v3623_v62  ;;  %v3637_v62 = vrot.slane %v7241_v63, 6  ;;  %v7264_v43 = vld [vmem:[%s6077_s29 + $0x6c] sm:$0xf] }
  0xb7   : > { %v7232_v46 = vsel %vm6314_vm6, %v8215_v47, %v8214_v30  ;;  %v8217_v4 = vmov %v8214_v30  ;;  %8219 = vst [vmem:[#allocation21_spill] sm:$0xff] %v7247_v14  ;;  %v3630_v30 = vrot.slane %v7220_v20, 6  ;;  %v4378_v56 = vrot.slane %v7264_v43, 10  ;;  %5168 = vmatpush3.bf16.msra.mxu1 %v5787_v13  ;;  %v7268_v47 = vld [vmem:[%s6077_s29 + $0x8c] sm:$0x3] }
  0xb8   : > { %8216 = vst [vmem:[#allocation20_spill] sm:$0xff] %v7232_v46  ;;  %v3629_v38 = vrot.slane %v8217_v4, 4  ;;  %v8220_v4 = vrot.slane %v6857_v18, 6  ;;  %v7286_v13 = vsel %vm6094_vm3, %v3160_v34, %v3161_v26  ;;  %v5829_v34 = vld [vmem:[%s6077_s29 + $0x74] sm:$0x3]  ;;  %v8248_v46 = vrot.slane %v6944_v50, 6 }
  0xba   : > { %v7258_v27 = vsel %vm6314_vm6, %v8221_v51, %v8220_v4  ;;  %v8223_v37 = vmov %v8220_v4  ;;  %v7272_v14 = vsel %vm6314_vm6, %v3629_v38, %v3630_v30  ;;  %v8225_v51 = vrot.slane %v6889_v33, 6  ;;  %v7291_v38 = vld [vmem:[%s8095_s1 + $0x80] sm:$0xff]  }
  0xbb   : > { %8222 = vst [vmem:[#allocation22_spill] sm:$0xff] %v7258_v27  ;;  %v3636_v2 = vrot.slane %v8223_v37, 4  ;;  %8224 = vst [vmem:[#allocation23_spill] sm:$0xff] %v7272_v14  ;;  %v8226_v4 = vrot.slane %v6886_v8, 10  ;;  %5401 = vmatprep.subr.bf16.mxu1 %v7291_v38  ;;  %v8232_v30 = vrot.slane %v6900_v6, 10 }
  0xbc   : > { %v8228_v22 = vmov %v8225_v51  ;;  %8229 = vst [vmem:[#allocation25_spill] sm:$0xff] %v7291_v38  ;;  %v8231_v38 = vrot.slane %v6903_v53, 6  ;;  %v7376_v14 = vld [vmem:[%s6077_s29 + $0xb0] sm:$0x3] }
  0xbd   : > { %v7280_v37 = vsel %vm6314_vm6, %v8226_v4, %v8225_v51  ;;  %v3643_v24 = vrot.slane %v8228_v22, 4  ;;  %v7298_v43 = vsel %vm6314_vm6, %v3636_v2, %v3637_v62  ;;  %v3644_v22 = vrot.slane %v7268_v47, 6  ;;  %v5828_v51 = vld [vmem:[%s6077_s29 + $0x70] sm:$0xf] }
  0xbe   : > { %8227 = vst [vmem:[#allocation24_spill] sm:$0xff] %v7280_v37  ;;  %8230 = vst [vmem:[#allocation26_spill] sm:$0xff] %v7298_v43  ;;  %v1075_v26 = vrot.slane %v5828_v51, 6  ;;  %v1078_v4 = vrot.slane %v5829_v34, 6  ;;  %v7314_v2 = vsel %vm6314_vm6, %v8232_v30, %v8231_v38  ;;  %v8234_v62 = vcombine.low %v7034_v59, %v7038_v58 }
  0xbf   : > { %8233 = vst [vmem:[#allocation27_spill] sm:$0xff] %v7314_v2  ;;  %v8235_v51 = vrot.slane %v7134_v15, 6  ;;  %v7326_v1 = vsel %vm6314_vm6, %v3643_v24, %v3644_v22  ;;  %v8237_v43 = vmov %v8231_v38  ;;  %v3651_v38 = vrot.slane %v7304_v45, 6  ;;  %v7347_v22 = vld [vmem:[%s6077_s29 + $0xa4] sm:$0x3]  ;;  %v8283_v2 = vld [vmem:[#allocation8_spill] sm:$0xff] }
  0xc0   : > { %5138 = vmatmul.mubr.msk.bf16.gmra.mrb[8].mxu1 %vm516_vm2, %v8234_v62  ;;  %8236 = vst [vmem:[#allocation28_spill] sm:$0xff] %v7326_v1  ;;  %v3650_v27 = vrot.slane %v8237_v43, 4  ;;  %v8238_v30 = vcombine.low %v7052_v0, %v7056_v21  ;;  %v8239_v59 = vrot.slane %v6773_v17, 5  ;;  %v3168_v58 = vrot.slane %v7121_v48, 5  ;;  %v5831_v0 = vld [vmem:[%s6077_s29 + $0x78] sm:$0xf] }
  0xc1   : > { %v1072_v34 = vsel %vm6314_vm6, %v1070_v3, %v8235_v51  ;;  %v5830_v3 = vld [vmem:[%s6077_s29 + $0x7c] sm:$0xf]  ;;  %v8240_v43 = vcombine.low %v7005_v42, %v7013_v39  ;;  %v4379_v21 = vrot.slane %v5831_v0, 10  ;;  %v8242_v48 = vrot.slane %v6929_v40, 6  ;;  %v5832_v1 = vld [vmem:[%s6077_s29 + $0x80] sm:$0x3] }
  0xc2   : > { %5141 = vmatprep.mubr.msk.bf16.mxu1 %vm516_vm2, %v8238_v30  ;;  %v3167_v15 = vrot.slane %v8239_v59, 4  ;;  %v1082_v62 = vrot.slane %v5830_v3, 6  ;;  %v7351_v17 = vsel %vm6314_vm6, %v3650_v27, %v3651_v38  ;;  %v8243_v51 = vrot.slane %v6926_v9, 10 }
  0xc3   : > { %5314 = vmatmul.mubr.msk.bf16.gmra.mrb[24].mxu0 %vm516_vm2, %v8240_v43  ;;  %8241 = vst [vmem:[#allocation29_spill] sm:$0xff] %v7351_v17  ;;  %v8245_v59 = vmov %v8242_v48  ;;  %v8246_v43 = vcombine.low %v7041_v25, %v7044_v12  ;;  %v4401_v0 = vcombine.low %v7217_v16, %v1072_v34  ;;  %v1077_v27 = vrot.slane %v1075_v26, 4 }
  0xc4   : > { %v7359_v30 = vsel %vm6314_vm6, %v8243_v51, %v8242_v48  ;;  %v3657_v3 = vrot.slane %v8245_v59, 4  ;;  %v3658_v24 = vrot.slane %v7347_v22, 6  ;;  %v1085_v37 = vrot.slane %v5832_v1, 6 }
  0xc5   : > { %8244 = vst [vmem:[#allocation30_spill] sm:$0xff] %v7359_v30  ;;  %5317 = vmatprep.mubr.msk.bf16.mxu0 %vm516_vm2, %v8246_v43  ;;  %v8247_v48 = vrot.slane %v6781_v55, 5  ;;  %v3175_v59 = vrot.slane %v7140_v61, 5  ;;  %v8249_v43 = vrot.slane %v6941_v52, 10  ;;  %v1084_v34 = vrot.slane %v1082_v62, 4 }
  0xc6   : > { %v7388_v1 = vsel %vm6314_vm6, %v3657_v3, %v3658_v24  ;;  %v8252_v55 = vmov %v8248_v46  ;;  %v3665_v61 = vrot.slane %v7376_v14, 6  ;;  %v7401_v24 = vsel %vm6094_vm3, %v3167_v15, %v3168_v58 }
  0xc7   : > { %v3174_v51 = vrot.slane %v8247_v48, 4  ;;  %v7384_v16 = vsel %vm6314_vm6, %v8249_v43, %v8248_v46  ;;  %8251 = vst [vmem:[#allocation32_spill] sm:$0xff] %v7388_v1  ;;  %v3664_v48 = vrot.slane %v8252_v55, 4  ;;  %v4757_v46 = vcombine.low %v6895_v31, %v7286_v13  ;;  %v5844_v1 = vld [vmem:[%s6077_s29 + $0xb0] sm:$0x3] }
  0xc8   : > { %8250 = vst [vmem:[#allocation31_spill] sm:$0xff] %v7384_v16  ;;  %v8254_v55 = vrot.slane %v6976_v28, 6  ;;  %v8255_v38 = vrot.slane %v6973_v29, 10  ;;  %v8258_v15 = vcombine.low %v7089_v19, %v7117_v41  ;;  %v1076_v58 = vsel %vm6314_vm6, %v4378_v56, %v1075_v26  ;;  %v5833_v56 = vld [vmem:[%s6077_s29 + $0x88] sm:$0xf] }
  0xc9   : > { %v7405_v3 = vsel %vm6314_vm6, %v3664_v48, %v3665_v61  ;;  %v1079_v48 = vsel %vm6314_vm6, %v1077_v27, %v1078_v4  ;;  %v7427_v61 = vsel %vm6094_vm3, %v3174_v51, %v3175_v59  ;;  %v1083_v41 = vsel %vm6314_vm6, %v4379_v21, %v1082_v62  ;;  %v8260_v51 = vld [vmem:[#allocation7_spill] sm:$0xff] }
  0xca   : > { %8253 = vst [vmem:[#allocation33_spill] sm:$0xff] %v7405_v3  ;;  %v7413_v17 = vsel %vm6314_vm6, %v8255_v38, %v8254_v55  ;;  %v8257_v31 = vmov %v8254_v55  ;;  %5142 = vmatmul.mubr.msk.bf16.gmra.mrb[12].mxu1 %vm516_vm2, %v8258_v15  ;;  %v7430_v38 = vld [vmem:[%s6077_s29 + $0xbc] sm:$0x3]  ;;  %v1086_v19 = vsel %vm6314_vm6, %v1084_v34, %v1085_v37  ;;  %v1089_v26 = vrot.slane %v5833_v56, 6  ;;  %v5834_v59 = vld [vmem:[%s6077_s29 + $0x94] sm:$0xf] }
  0xcb   : > { %8256 = vst [vmem:[#allocation34_spill] sm:$0xff] %v7413_v17  ;;  %v3671_v13 = vrot.slane %v8257_v31, 4  ;;  %5145 = vmatprep.mubr.msk.bf16.mxu1 %vm516_vm2, %v4401_v0  ;;  %v3672_v4 = vrot.slane %v7430_v38, 6  ;;  %v8259_v27 = vcombine.low %v7059_v32, %v7062_v49  ;;  %v4758_v0 = vcombine.low %v8260_v51, %v7401_v24  ;;  %v5835_v51 = vld [vmem:[%s6077_s29 + $0x84] sm:$0xf] }
  0xcc   : > { %v1096_v31 = vrot.slane %v5834_v59, 6  ;;  %v8261_v62 = vrot.slane %v6997_v44, 6  ;;  %v8262_v21 = vrot.slane %v6989_v57, 10  ;;  %v4402_v56 = vcombine.low %v1076_v58, %v1079_v48  ;;  %v7463_v55 = vld [vmem:[%s6077_s29 + $0xc8] sm:$0x3] }
  0xcd   : > { %5318 = vmatmul.mubr.msk.bf16.gmra.mrb[28].mxu0 %vm516_vm2, %v8259_v27  ;;  %v8265_v27 = vld [vmem:[#allocation6_spill] sm:$0xff]  ;;  %v4380_v59 = vrot.slane %v5835_v51, 10  ;;  %v7467_v43 = vsel %vm6314_vm6, %v3671_v13, %v3672_v4  ;;  %v3679_v58 = vrot.slane %v7463_v55, 6  ;;  %v1091_v48 = vrot.slane %v1089_v26, 4  ;;  %v7488_v17 = vld [vmem:[%s6077_s29 + $0xd4] sm:$0x3] }
  0xce   : > { %v7454_v37 = vsel %vm6314_vm6, %v8262_v21, %v8261_v62  ;;  %v8264_v34 = vmov %v8261_v62  ;;  %5329 = vmatprep.mubr.msk.bf16.mxu0 %vm516_vm2, %v4757_v46  ;;  %v4759_v24 = vcombine.low %v8265_v27, %v7427_v61  ;;  %8266 = vst [vmem:[#allocation6_spill] sm:$0xff] %v7467_v43  ;;  %v4403_v62 = vcombine.low %v1083_v41, %v1086_v19  ;;  %v5836_v21 = vld [vmem:[%s6077_s29 + $0x8c] sm:$0x3]  ;;  %v5837_v61 = vld [vmem:[%s6077_s29 + $0x90] sm:$0xf] }
  0xcf   : > { %8263 = vst [vmem:[#allocation7_spill] sm:$0xff] %v7454_v37  ;;  %v3678_v15 = vrot.slane %v8264_v34, 4  ;;  %v1092_v3 = vrot.slane %v5836_v21, 6  ;;  %v4381_v34 = vrot.slane %v5837_v61, 10  ;;  %v8267_v27 = vrot.slane %v7013_v39, 6 }
  0xd0   : > { %v8268_v51 = vrot.slane %v7005_v42, 10  ;;  %v8271_v19 = vrot.slane %v6801_v5, 5  ;;  %v1098_v21 = vrot.slane %v1096_v31, 4  ;;  %v5838_v46 = vld [vmem:[%s6077_s29 + $0x98] sm:$0x3]  ;;  %v1113_v30 = vrot.slane %v5844_v1, 6 }
  0xd1   : > { %v8270_v13 = vmov %v8267_v27  ;;  %v1099_v43 = vrot.slane %v5838_v46, 6  ;;  %v7492_v61 = vsel %vm6314_vm6, %v3678_v15, %v3679_v58  ;;  %v8273_v46 = vrot.slane %v6809_v7, 5  ;;  %v5788_v58 = vld [vmem:[%s8095_s1 + $0x108] sm:$0xff]   ;;  %v7524_v37 = vld [vmem:[%s6077_s29 + $0xe0] sm:$0x3] }
  0xd2   : > { %v7480_v16 = vsel %vm6314_vm6, %v8268_v51, %v8267_v27  ;;  %v3685_v41 = vrot.slane %v8270_v13, 4  ;;  %v3181_v4 = vrot.slane %v8271_v19, 4  ;;  %8272 = vst [vmem:[#allocation36_spill] sm:$0xff] %v7492_v61  ;;  %v1090_v27 = vsel %vm6314_vm6, %v4380_v59, %v1089_v26  ;;  %5146 = vmatmul.mubr.msk.bf16.gmra.mrb[16].mxu1 %vm516_vm2, %v4402_v56 }
  0xd3   : > { %8269 = vst [vmem:[#allocation35_spill] sm:$0xff] %v7480_v16  ;;  %v3182_v51 = vrot.slane %v7165_v35, 5  ;;  %v3686_v13 = vrot.slane %v7488_v17, 6  ;;  %v3188_v19 = vrot.slane %v8273_v46, 4  ;;  %v3189_v15 = vrot.slane %v7188_v54, 5  ;;  %5149 = vmatprep.mubr.msk.bf16.mxu1 %vm516_vm2, %v4403_v62 }
  0xd4   : > { %v8274_v26 = vrot.slane %v7044_v12, 6  ;;  %v8275_v35 = vrot.slane %v7041_v25, 10  ;;  %v1093_v7 = vsel %vm6314_vm6, %v1091_v48, %v1092_v3  ;;  %v1097_v54 = vsel %vm6314_vm6, %v4381_v34, %v1096_v31  ;;  %v5839_v46 = vld [vmem:[%s6077_s29 + $0xa0] sm:$0xf]  ;;  %v7559_v3 = vld [vmem:[%s6077_s29 + $0xec] sm:$0x3] }
  0xd5   : > { %v1103_v61 = vrot.slane %v5839_v46, 6  ;;  %5330 = vmatmul.mubr.msk.bf16.vlgmr.msra.gmra.mrb[0].mxu0 %vm516_vm2, %v4758_v0  ;;  %v1100_v62 = vsel %vm6314_vm6, %v1098_v21, %v1099_v43  ;;  %v3693_v31 = vrot.slane %v7524_v37, 6  ;;  %v8278_v48 = vld [vmem:[#allocation5_spill] sm:$0xff]  ;;  %v3183_v34 = vsel %vm6094_vm3, %v3181_v4, %v3182_v51 }
  0xd6   : > { %v7513_v59 = vsel %vm6314_vm6, %v8275_v35, %v8274_v26  ;;  %v8276_v5 = vmov %v8274_v26  ;;  %v7528_v26 = vsel %vm6314_vm6, %v3685_v41, %v3686_v13  ;;  %5362 = vmatpush3.bf16.msra.mxu0 %v8278_v48  ;;  %5333 = vmatprep.mubr.msk.bf16.mxu0 %vm516_vm2, %v4759_v24  ;;  %v5841_v41 = vld [vmem:[%s6077_s29 + $0x9c] sm:$0xf]  ;;  %v8279_v13 = vrot.slane %v7062_v49, 6  ;;  %v5842_v4 = vld [vmem:[%s6077_s29 + $0xa4] sm:$0x3] }
  0xd7   : > { %v3692_v56 = vrot.slane %v8276_v5, 4  ;;  %8277 = vst [vmem:[#allocation37_spill] sm:$0xff] %v7528_v26  ;;  %v5840_v5 = vld [vmem:[%s6077_s29 + $0xac] sm:$0xf]  ;;  %v4382_v0 = vrot.slane %v5841_v41, 10  ;;  %v8280_v43 = vrot.slane %v7059_v32, 10  ;;  %v4404_v48 = vcombine.low %v1090_v27, %v1093_v7  ;;  %5363 = vmatprep.subr.bf16.mxu0 %v5788_v58 }
  0xd8   : > { %v1110_v35 = vrot.slane %v5840_v5, 6  ;;  %v8281_v46 = vmov %v8279_v13  ;;  %v3190_v24 = vsel %vm6094_vm3, %v3188_v19, %v3189_v15  ;;  %v1106_v51 = vrot.slane %v5842_v4, 6  ;;  %v5791_v41 = vld [vmem:[%s8095_s1 + $0x110] sm:$0xff]   ;;  %v8282_v15 = vld [vmem:[#allocation9_spill] sm:$0xff]  ;;  %v5843_v4 = vld [vmem:[%s6077_s29 + $0xa8] sm:$0xf] }
  0xd9   : > { %v7548_v21 = vsel %vm6314_vm6, %v8280_v43, %v8279_v13  ;;  %v3699_v5 = vrot.slane %v8281_v46, 4  ;;  %v7563_v13 = vsel %vm6314_vm6, %v3692_v56, %v3693_v31  ;;  %v4405_v43 = vcombine.low %v1097_v54, %v1100_v62 }
  0xda   : > { %v1105_v46 = vrot.slane %v1103_v61, 4  ;;  %v4831_v27 = vcombine.low %v7513_v59, %v7563_v13  ;;  %v3700_v19 = vrot.slane %v7559_v3, 6  ;;  %v4760_v7 = vcombine.low %v8282_v15, %v3183_v34  ;;  %5364 = vmatpush3.bf16.msra.mxu0 %v5788_v58  ;;  %5150 = vmatmul.mubr.msk.bf16.gmra.mrb[20].mxu1 %vm516_vm2, %v4404_v48 }
  0xdb   : > { %v4383_v26 = vrot.slane %v5843_v4, 10  ;;  %v1112_v16 = vrot.slane %v1110_v35, 4  ;;  %v4761_v32 = vcombine.low %v8283_v2, %v3190_v24  ;;  %v8284_v56 = vrot.slane %v6847_v23, 5  ;;  %5365 = vmatprep.subr.bf16.mxu0 %v5791_v41  ;;  %v5796_v2 = vld [vmem:[%s8095_s1 + $0x118] sm:$0xff]   ;;  %5153 = vmatprep.mubr.msk.bf16.mxu1 %vm516_vm2, %v4405_v43 }
  0xdc   : > { %v3196_v54 = vrot.slane %v7220_v20, 5  ;;  %v7577_v62 = vsel %vm6314_vm6, %v3699_v5, %v3700_v19  ;;  %v4739_v34 = vrot.slane %v6854_v10, 9  ;;  %v8285_v15 = vrot.slane %v6857_v18, 5  ;;  %v5845_v5 = vld [vmem:[%s6077_s29 + $0xb8] sm:$0xf] }
  0xdd   : > { %v3195_v31 = vrot.slane %v8284_v56, 4  ;;  %v3203_v4 = vrot.slane %v7241_v63, 5  ;;  %v4832_v20 = vcombine.low %v7548_v21, %v7577_v62  ;;  %v1104_v10 = vsel %vm6314_vm6, %v4382_v0, %v1103_v61  ;;  %5334 = vmatmul.mubr.msk.bf16.gmra.mrb[4].mxu0 %vm516_vm2, %v4760_v7  ;;  %v5847_v7 = vld [vmem:[%s6077_s29 + $0xbc] sm:$0x3] }
  0xde   : > { %v3202_v1 = vrot.slane %v8285_v15, 4  ;;  %v1107_v58 = vsel %vm6314_vm6, %v1105_v46, %v1106_v51  ;;  %v1117_v48 = vrot.slane %v5845_v5, 6  ;;  %v1111_v63 = vsel %vm6314_vm6, %v4383_v26, %v1110_v35  ;;  %5337 = vmatprep.mubr.msk.bf16.mxu0 %vm516_vm2, %v4761_v32  ;;  %5366 = vmatpush3.bf16.msra.mxu0 %v5791_v41  ;;  %v5846_v32 = vld [vmem:[%s6077_s29 + $0xb4] sm:$0xf]  ;;  %v5848_v5 = vld [vmem:[%s6077_s29 + $0x18] sm:$0xf] }
  0xdf   : > { %v1114_v24 = vsel %vm6314_vm6, %v1112_v16, %v1113_v30  ;;  %v3207_v43 = vrot.slane %v6889_v33, 5  ;;  %v8286_v61 = vmov %v8284_v56  ;;  %v8287_v0 = vrot.slane %v6844_v60, 9  ;;  %5367 = vmatprep.subr.bf16.mxu0 %v5796_v2 }
  0xe0   : > { %v3197_v46 = vsel %vm6094_vm3, %v3195_v31, %v3196_v54  ;;  %v3214_v26 = vrot.slane %v6903_v53, 5  ;;  %v4406_v35 = vcombine.low %v1104_v10, %v1107_v58  ;;  %v8288_v30 = vmov %v8285_v15 }
  0xe1   : > { %v3194_v51 = vsel %vm6094_vm3, %v8287_v0, %v8286_v61  ;;  %v3201_v33 = vsel %vm6094_vm3, %v4739_v34, %v8288_v30  ;;  %v3204_v23 = vsel %vm6094_vm3, %v3202_v1, %v3203_v4  ;;  %v4407_v60 = vcombine.low %v1111_v63, %v1114_v24  ;;  %v5851_v30 = vld [vmem:[%s6077_s29 + $0x28] sm:$0xf] }
  0xe2   : > { %v4384_v16 = vrot.slane %v5846_v32, 10  ;;  %v1119_v19 = vrot.slane %v1117_v48, 4  ;;  %v1120_v56 = vrot.slane %v5847_v7, 6  ;;  %v4762_v31 = vcombine.low %v3194_v51, %v3197_v46  ;;  %5368 = vmatpush3.bf16.msra.mxu0 %v5796_v2  ;;  %5154 = vmatmul.mubr.msk.bf16.gmra.mrb[24].mxu1 %vm516_vm2, %v4406_v35  ;;  %v5850_v35 = vld [vmem:[%s6077_s29 + $0x24] sm:$0xf] }
  0xe3   : > { %v4740_v41 = vrot.slane %v6886_v8, 9  ;;  %v4763_v53 = vcombine.low %v3201_v33, %v3204_v23  ;;  %v3209_v54 = vrot.slane %v3207_v43, 4  ;;  %v3210_v18 = vrot.slane %v7268_v47, 5  ;;  %5157 = vmatprep.mubr.msk.bf16.mxu1 %vm516_vm2, %v4407_v60  ;;  %v5853_v60 = vld [vmem:[%s6077_s29 + $0x34] sm:$0xf] }
  0xe4   : > { %v4741_v34 = vrot.slane %v6900_v6, 9  ;;  %v3216_v15 = vrot.slane %v3214_v26, 4  ;;  %v3217_v1 = vrot.slane %v7304_v45, 5  ;;  %v1118_v4 = vsel %vm6314_vm6, %v4384_v16, %v1117_v48  ;;  %v5849_v48 = vld [vmem:[%s6077_s29 + $0x1c] sm:$0xf] }
  0xe5   : > { %v1121_v8 = vsel %vm6314_vm6, %v1119_v19, %v1120_v56  ;;  %5338 = vmatmul.mubr.msk.bf16.gmra.mrb[8].mxu0 %vm516_vm2, %v4762_v31  ;;  %v3221_v47 = vrot.slane %v6929_v40, 5  ;;  %v3208_v6 = vsel %vm6094_vm3, %v4740_v41, %v3207_v43  ;;  %v3211_v45 = vsel %vm6094_vm3, %v3209_v54, %v3210_v18  ;;  %v8289_v54 = vld [vmem:[#allocation25_spill] sm:$0xff] }
  0xe6   : > { %5341 = vmatprep.mubr.msk.bf16.mxu0 %vm516_vm2, %v4763_v53  ;;  %v3228_v2 = vrot.slane %v6944_v50, 5  ;;  %v4408_v10 = vcombine.low %v1118_v4, %v1121_v8  ;;  %v3215_v58 = vsel %vm6094_vm3, %v4741_v34, %v3214_v26  ;;  %v3218_v36 = vsel %vm6094_vm3, %v3216_v15, %v3217_v1  ;;  %v5855_v34 = vld [vmem:[%s6077_s29 + $0x3c] sm:$0xf]  ;;  %v5856_v15 = vld [vmem:[%s6077_s29 + $0x40] sm:$0xf] }
  0xe7   : > { %v4485_v40 = vcombine.low %v5848_v5, %v5849_v48  ;;  %v4764_v63 = vcombine.low %v3208_v6, %v3211_v45  ;;  %v4742_v24 = vrot.slane %v6926_v9, 9  ;;  %v4765_v43 = vcombine.low %v3215_v58, %v3218_v36 }
  0xe8   : > { %v3223_v61 = vrot.slane %v3221_v47, 4  ;;  %v3224_v0 = vrot.slane %v7347_v22, 5  ;;  %v4743_v50 = vrot.slane %v6941_v52, 9  ;;  %v3230_v51 = vrot.slane %v3228_v2, 4 }
  0xe9   : > { %v3231_v46 = vrot.slane %v7376_v14, 5  ;;  %v3235_v9 = vrot.slane %v6976_v28, 5  ;;  %v3222_v22 = vsel %vm6094_vm3, %v4742_v24, %v3221_v47  ;;  %v3242_v26 = vrot.slane %v6997_v44, 5  ;;  %v5852_v28 = vld [vmem:[%s6077_s29 + $0x30] sm:$0xf] }
  0xea   : > { %5158 = vmatmul.mubr.msk.bf16.gmra.mrb[28].mxu1 %vm516_vm2, %v4408_v10  ;;  %v3225_v52 = vsel %vm6094_vm3, %v3223_v61, %v3224_v0  ;;  %v4486_v33 = vcombine.low %v5850_v35, %v5851_v30  ;;  %v3229_v14 = vsel %vm6094_vm3, %v4743_v50, %v3228_v2  ;;  %v4487_v32 = vcombine.low %v5852_v28, %v5853_v60  ;;  %v5858_v47 = vld [vmem:[%s6077_s29 + $0x4c] sm:$0xf]  ;;  %v5859_v2 = vld [vmem:[%s8095_s1 + $0x90] sm:$0xff]   ;;  %v5862_v24 = vld [vmem:[%s6077_s29 + $0x58] sm:$0xf] }
  0xeb   : > { %5169 = vmatprep.mubr.msk.bf16.mxu1 %vm516_vm2, %v4485_v40  ;;  %v3232_v23 = vsel %vm6094_vm3, %v3230_v51, %v3231_v46  ;;  %v4766_v16 = vcombine.low %v3222_v22, %v3225_v52  ;;  %v4744_v19 = vrot.slane %v6973_v29, 9  ;;  %v3237_v56 = vrot.slane %v3235_v9, 4  ;;  %v5854_v29 = vld [vmem:[%s8095_s1 + $0x88] sm:$0xff]   ;;  %v5863_v50 = vld [vmem:[%s6077_s29 + $0x60] sm:$0xf] }
  0xec   : > { %v4767_v7 = vcombine.low %v3229_v14, %v3232_v23  ;;  %v3238_v44 = vrot.slane %v7430_v38, 5  ;;  %v4745_v31 = vrot.slane %v6989_v57, 9  ;;  %v3244_v41 = vrot.slane %v3242_v26, 4  ;;  %v5865_v14 = vld [vmem:[%s6077_s29 + $0x6c] sm:$0xf] }
  0xed   : > { %5342 = vmatmul.mubr.msk.bf16.gmra.mrb[12].mxu0 %vm516_vm2, %v4764_v63  ;;  %v3245_v53 = vrot.slane %v7463_v55, 5  ;;  %v3249_v57 = vrot.slane %v7013_v39, 5  ;;  %v3236_v38 = vsel %vm6094_vm3, %v4744_v19, %v3235_v9  ;;  %v3256_v18 = vrot.slane %v7044_v12, 5  ;;  %v5857_v39 = vld [vmem:[%s6077_s29 + $0x48] sm:$0xf]  ;;  %v8291_v19 = vld [vmem:[#allocation12_spill] sm:$0xff] }
  0xee   : > { %5345 = vmatprep.mubr.msk.bf16.mxu0 %vm516_vm2, %v4765_v43  ;;  %v3239_v55 = vsel %vm6094_vm3, %v3237_v56, %v3238_v44  ;;  %v4488_v1 = vcombine.low %v5855_v34, %v5856_v15  ;;  %v3243_v4 = vsel %vm6094_vm3, %v4745_v31, %v3242_v26  ;;  %v4489_v6 = vcombine.low %v5857_v39, %v5858_v47  ;;  %v5861_v63 = vld [vmem:[%s6077_s29 + $0x54] sm:$0xf]  ;;  %v8290_v9 = vld [vmem:[#allocation10_spill] sm:$0xff]  ;;  %v5867_v28 = vld [vmem:[%s6077_s29 + $0x78] sm:$0xf] }
  0xef   : > { %v3246_v8 = vsel %vm6094_vm3, %v3244_v41, %v3245_v53  ;;  %v4768_v45 = vcombine.low %v3236_v38, %v3239_v55  ;;  %v4746_v12 = vrot.slane %v7005_v42, 9  ;;  %v3251_v58 = vrot.slane %v3249_v57, 4  ;;  %v5860_v42 = vld [vmem:[%s8095_s1 + $0x98] sm:$0xff]   ;;  %v5869_v44 = vld [vmem:[%s6077_s29 + $0x88] sm:$0xf]  ;;  %v8295_v38 = vld [vmem:[#allocation15_spill] sm:$0xff] }
  0xf0   : > { %v4769_v10 = vcombine.low %v3243_v4, %v3246_v8  ;;  %v3252_v36 = vrot.slane %v7488_v17, 5  ;;  %v4747_v5 = vrot.slane %v7041_v25, 9  ;;  %v3258_v48 = vrot.slane %v3256_v18, 4  ;;  %v5868_v60 = vld [vmem:[%s6077_s29 + $0x7c] sm:$0xf]  ;;  %v8298_v34 = vld [vmem:[#allocation17_spill] sm:$0xff] }
  0xf1   : > { %v3259_v40 = vrot.slane %v7524_v37, 5  ;;  %v3263_v17 = vrot.slane %v7062_v49, 5  ;;  %v3250_v25 = vsel %vm6094_vm3, %v4746_v12, %v3249_v57  ;;  %v4490_v43 = vcombine.low %v5861_v63, %v5862_v24  ;;  %v5864_v49 = vld [vmem:[%s6077_s29 + $0x64] sm:$0xf]  ;;  %v5871_v53 = vld [vmem:[%s6077_s29 + $0x94] sm:$0xf] }
  0xf2   : > { %5170 = vmatmul.mubr.msk.bf16.vlgmr.msra.gmra.mrb[0].mxu1 %vm516_vm2, %v4486_v33  ;;  %v3253_v37 = vsel %vm6094_vm3, %v3251_v58, %v3252_v36  ;;  %v3257_v61 = vsel %vm6094_vm3, %v4747_v5, %v3256_v18  ;;  %v4491_v51 = vcombine.low %v5863_v50, %v5864_v49  ;;  %v4748_v22 = vrot.slane %v8290_v9, 9  ;;  %v5870_v31 = vld [vmem:[%s6077_s29 + $0x84] sm:$0xf]  ;;  %v8294_v57 = vld [vmem:[#allocation11_spill] sm:$0xff]  ;;  %v8297_v18 = vld [vmem:[#allocation14_spill] sm:$0xff] }
  0xf3   : > { %5405 = vmatpush3.bf16.msra.mxu1 %v8289_v54  ;;  %5173 = vmatprep.mubr.msk.bf16.mxu1 %vm516_vm2, %v4487_v32  ;;  %v3260_v0 = vsel %vm6094_vm3, %v3258_v48, %v3259_v40  ;;  %v4770_v46 = vcombine.low %v3250_v25, %v3253_v37  ;;  %v3265_v26 = vrot.slane %v3263_v17, 4  ;;  %v3266_v35 = vrot.slane %v7559_v3, 5  ;;  %v5866_v3 = vld [vmem:[%s6077_s29 + $0x70] sm:$0xf]  ;;  %v7757_v4 = vld [vmem:[%s6077_s29 + $0x9c] sm:$0xf] }
  0xf4   : > { %5402 = vmatprep.subr.bf16.mxu1 %v5854_v29  ;;  %v4771_v52 = vcombine.low %v3257_v61, %v3260_v0  ;;  %v3264_v30 = vsel %vm6094_vm3, %v4748_v22, %v3263_v17  ;;  %v4492_v23 = vcombine.low %v5865_v14, %v5866_v3  ;;  %v4493_v32 = vcombine.low %v5867_v28, %v5868_v60  ;;  %v5872_v54 = vld [vmem:[%s6077_s29 + $0x90] sm:$0xf]  ;;  %v7762_v39 = vld [vmem:[%s6077_s29 + $0xac] sm:$0xf]  ;;  %v7765_v47 = vld [vmem:[%s6077_s29 + $0xa8] sm:$0xf] }
  0xf5   : > { %5346 = vmatmul.mubr.msk.bf16.gmra.mrb[16].mxu0 %vm516_vm2, %v4766_v16  ;;  %v3267_v33 = vsel %vm6094_vm3, %v3265_v26, %v3266_v35  ;;  %v4494_v41 = vcombine.low %v5870_v31, %v5869_v44  ;;  %v8296_v55 = vcombine.low %v8294_v57, %v8295_v38  ;;  %v8299_v15 = vcombine.low %v8297_v18, %v8298_v34  ;;  %v8303_v58 = vld [vmem:[#allocation18_spill] sm:$0xff]  ;;  %v8304_v36 = vld [vmem:[#allocation21_spill] sm:$0xff]  ;;  %v7780_v48 = vld [vmem:[%s6077_s29 + $0xb8] sm:$0xf] }
  0xf6   : > { %5349 = vmatprep.mubr.msk.bf16.mxu0 %vm516_vm2, %v4767_v7  ;;  %v4772_v16 = vcombine.low %v3264_v30, %v3267_v33  ;;  %v8292_v7 = vld [vmem:[#allocation13_spill] sm:$0xff]  ;;  %v8305_v5 = vcombine.low %v8303_v58, %v8304_v36  ;;  %v7783_v40 = vld [vmem:[%s6077_s29 + $0xb4] sm:$0xf]  ;;  %v4529_v63 = vrot.slane %v5867_v28, 9  ;;  %v1931_v0 = vrot.slane %v5869_v44, 5  ;;  %v8306_v50 = vld [vmem:[#allocation20_spill] sm:$0xff] }
  0xf7   : > { %5406 = vmatpush3.bf16.msra.mxu1 %v5854_v29  ;;  %v8293_v56 = vcombine.low %v8291_v19, %v8292_v7  ;;  %v4495_v29 = vcombine.low %v5872_v54, %v5871_v53  ;;  %v7788_v17 = vld [vmem:[%s6077_s29 + $0xc4] sm:$0xf]  ;;  %v7791_v25 = vld [vmem:[%s6077_s29 + $0xc0] sm:$0xf]  ;;  %v8307_v49 = vld [vmem:[#allocation23_spill] sm:$0xff]  ;;  %v1938_v22 = vrot.slane %v5871_v53, 5 }
  0xf8   : > { %5403 = vmatprep.subr.bf16.mxu1 %v5859_v2  ;;  %v4499_v37 = vcombine.low %v7791_v25, %v7788_v17  ;;  %v8310_v26 = vld [vmem:[#allocation26_spill] sm:$0xff]  ;;  %v7811_v30 = vld [vmem:[%s6077_s29 + $0xd0] sm:$0xf]  ;;  %v4530_v3 = vrot.slane %v5870_v31, 9  ;;  %v5885_v7 = vld [vmem:[%s6077_s29 + $0x98] sm:$0x3] }
  0xf9   : > { %v7814_v33 = vld [vmem:[%s6077_s29 + $0xcc] sm:$0xf]  ;;  %v1940_v19 = vrot.slane %v1938_v22, 4  ;;  %v8312_v53 = vld [vmem:[#allocation24_spill] sm:$0xff]  ;;  %v8315_v18 = vld [vmem:[#allocation27_spill] sm:$0xff] }
  0xfa   : > { %5174 = vmatmul.mubr.msk.bf16.gmra.mrb[4].mxu1 %vm516_vm2, %v4488_v1  ;;  %v7754_v1 = vld [vmem:[%s6077_s29 + $0xa0] sm:$0xf]  ;;  %v4500_v14 = vcombine.low %v7814_v33, %v7811_v30  ;;  %v5884_v28 = vld [vmem:[%s6077_s29 + $0x8c] sm:$0x3]  ;;  %v1932_v44 = vsel %vm6094_vm3, %v4530_v3, %v1931_v0  ;;  %v5887_v36 = vld [vmem:[%s6077_s29 + $0xb0] sm:$0x3] }
  0xfb   : > { %5177 = vmatprep.mubr.msk.bf16.mxu1 %vm516_vm2, %v4489_v6  ;;  %5407 = vmatpush3.bf16.msra.mxu1 %v5859_v2  ;;  %v4496_v8 = vcombine.low %v7757_v4, %v7754_v1  ;;  %v4497_v6 = vcombine.low %v7765_v47, %v7762_v39  ;;  %v8301_v2 = vld [vmem:[#allocation19_spill] sm:$0xff]  ;;  %v8316_v34 = vld [vmem:[#allocation29_spill] sm:$0xff] }
  0xfc   : > { %5404 = vmatprep.subr.bf16.mxu1 %v5860_v42 }
  0xfd   : > { %5350 = vmatmul.mubr.msk.bf16.gmra.mrb[20].mxu0 %vm516_vm2, %v4768_v45  ;;  %v8300_v45 = vld [vmem:[#allocation16_spill] sm:$0xff] }
  0xfe   : > { %5353 = vmatprep.mubr.msk.bf16.mxu0 %vm516_vm2, %v4769_v10  ;;  %v8302_v12 = vcombine.low %v8300_v45, %v8301_v2  ;;  %v1924_v10 = vrot.slane %v5868_v60, 5  ;;  %v1934_v60 = vrot.slane %v5884_v28, 5  ;;  %v5886_v2 = vld [vmem:[%s6077_s29 + $0xa4] sm:$0x3]  ;;  %v8324_v28 = vld [vmem:[#allocation34_spill] sm:$0xff] }
  0xff   : > { %5408 = vmatpush3.bf16.msra.mxu1 %v5860_v42  ;;  %v4498_v42 = vcombine.low %v7783_v40, %v7780_v48 }
 0x100   : > { %v1926_v24 = vrot.slane %v1924_v10, 4 }
 0x102   : > { %5178 = vmatmul.mubr.msk.bf16.gmra.mrb[8].mxu1 %vm516_vm2, %v4490_v43  ;;  %v5881_v43 = vld [vmem:[%s6077_s29 + $0x80] sm:$0x3] }
 0x103   : > { %5181 = vmatprep.mubr.msk.bf16.mxu1 %vm516_vm2, %v4491_v51  ;;  %v1927_v61 = vrot.slane %v5881_v43, 5  ;;  %v8308_v51 = vcombine.low %v8306_v50, %v8307_v49  ;;  %v8322_v50 = vld [vmem:[#allocation33_spill] sm:$0xff] }
 0x105   : > { %5354 = vmatmul.mubr.msk.bf16.gmra.mrb[24].mxu0 %vm516_vm2, %v4770_v46  ;;  %v1925_v46 = vsel %vm6094_vm3, %v4529_v63, %v1924_v10  ;;  %v1928_v9 = vsel %vm6094_vm3, %v1926_v24, %v1927_v61  ;;  %v4533_v10 = vrot.slane %v7765_v47, 9  ;;  %v8319_v63 = vld [vmem:[#allocation32_spill] sm:$0xff]  ;;  %v1966_v61 = vrot.slane %v7788_v17, 5 }
 0x106   : > { %5357 = vmatprep.mubr.msk.bf16.mxu0 %vm516_vm2, %v4771_v52  ;;  %v8309_v52 = vld [vmem:[#allocation22_spill] sm:$0xff] }
 0x107   : > { %v8311_v35 = vcombine.low %v8309_v52, %v8310_v26  ;;  %v4535_v26 = vrot.slane %v7791_v25, 9 }
 0x109   : > { %v1967_v25 = vsel %vm6094_vm3, %v4535_v26, %v1966_v61 }
 0x10a   : > { %5182 = vmatmul.mubr.msk.bf16.gmra.mrb[12].mxu1 %vm516_vm2, %v4492_v23  ;;  %v1933_v23 = vrot.slane %v1931_v0, 4  ;;  %v8321_v0 = vld [vmem:[#allocation31_spill] sm:$0xff] }
 0x10b   : > { %5185 = vmatprep.mubr.msk.bf16.mxu1 %vm516_vm2, %v4493_v32  ;;  %v4553_v32 = vcombine.low %v1925_v46, %v1928_v9  ;;  %v8323_v49 = vcombine.low %v8321_v0, %v8322_v50  ;;  %v4534_v46 = vrot.slane %v7783_v40, 9  ;;  %v1973_v40 = vrot.slane %v7811_v30, 5 }
 0x10c   : > { %v1935_v31 = vsel %vm6094_vm3, %v1933_v23, %v1934_v60  ;;  %v8325_v60 = vld [vmem:[#allocation6_spill] sm:$0xff]  ;;  %v4536_v30 = vrot.slane %v7814_v33, 9 }
 0x10d   : > { %5358 = vmatmul.mubr.msk.bf16.gmra.mrb[28].mxu0 %vm516_vm2, %v4772_v16  ;;  %v4531_v16 = vrot.slane %v5872_v54, 9 }
 0x10e   : > { %5369 = vmatprep.mubr.msk.bf16.mxu0 %vm516_vm2, %v8293_v56  ;;  %v1941_v56 = vrot.slane %v5885_v7, 5  ;;  %v8328_v7 = vld [vmem:[#allocation36_spill] sm:$0xff] }
 0x10f   : > { %v1939_v57 = vsel %vm6094_vm3, %v4531_v16, %v1938_v22  ;;  %v5888_v22 = vld [vmem:[%s6077_s29 + $0xbc] sm:$0x3] }
 0x110   : > { %v1942_v38 = vsel %vm6094_vm3, %v1940_v19, %v1941_v56  ;;  %v1962_v52 = vrot.slane %v5888_v22, 5  ;;  %v8327_v19 = vld [vmem:[#allocation7_spill] sm:$0xff] }
 0x111   : > { %v8329_v56 = vcombine.low %v8327_v19, %v8328_v7 }
 0x112   : > { %5186 = vmatmul.mubr.msk.bf16.gmra.mrb[16].mxu1 %vm516_vm2, %v4494_v41  ;;  %v1945_v41 = vrot.slane %v7754_v1, 5  ;;  %v4555_v1 = vcombine.low %v1939_v57, %v1942_v38  ;;  %v8330_v38 = vld [vmem:[#allocation35_spill] sm:$0xff] }
 0x113   : > { %5189 = vmatprep.mubr.msk.bf16.mxu1 %vm516_vm2, %v4495_v29  ;;  %v8313_v29 = vld [vmem:[#allocation28_spill] sm:$0xff] }
 0x114   : > { %v8314_v54 = vcombine.low %v8312_v53, %v8313_v29  ;;  %v1947_v45 = vrot.slane %v1945_v41, 4  ;;  %v5890_v53 = vld [vmem:[%s6077_s29 + $0xd4] sm:$0x3] }
 0x115   : > { %5370 = vmatmul.mubr.msk.bf16.vlgmr.msra.gmra.mrb[0].mxu0 %vm516_vm2, %v8296_v55  ;;  %v1952_v55 = vrot.slane %v7762_v39, 5  ;;  %v1976_v29 = vrot.slane %v5890_v53, 5 }
 0x116   : > { %5373 = vmatprep.mubr.msk.bf16.mxu0 %vm516_vm2, %v8299_v15  ;;  %v8317_v15 = vcombine.low %v8315_v18, %v8316_v34 }
 0x117   : > { %v1954_v58 = vrot.slane %v1952_v55, 4  ;;  %v1953_v24 = vsel %vm6094_vm3, %v4533_v10, %v1952_v55  ;;  %v8331_v55 = vld [vmem:[#allocation37_spill] sm:$0xff] }
 0x118   : > { %v8332_v18 = vcombine.low %v8330_v38, %v8331_v55 }
 0x11a   : > { %5190 = vmatmul.mubr.msk.bf16.gmra.mrb[20].mxu1 %vm516_vm2, %v4496_v8  ;;  %v4554_v8 = vcombine.low %v1932_v44, %v1935_v31 }
 0x11b   : > { %5193 = vmatprep.mubr.msk.bf16.mxu1 %vm516_vm2, %v4497_v6  ;;  %v4532_v6 = vrot.slane %v7757_v4, 9 }
 0x11d   : > { %5374 = vmatmul.mubr.msk.bf16.gmra.mrb[4].mxu0 %vm516_vm2, %v8302_v12  ;;  %v1948_v12 = vrot.slane %v5886_v2, 5  ;;  %v1946_v39 = vsel %vm6094_vm3, %v4532_v6, %v1945_v41  ;;  %v1975_v41 = vrot.slane %v1973_v40, 4 }
 0x11e   : > { %5377 = vmatprep.mubr.msk.bf16.mxu0 %vm516_vm2, %v8305_v5  ;;  %v1955_v5 = vrot.slane %v5887_v36, 5  ;;  %v7924_v36 = vld [vmem:[%s8096_s2] ss:$0 sm:$0xff] }
 0x11f   : > { %v1949_v4 = vsel %vm6094_vm3, %v1947_v45, %v1948_v12  ;;  %v1977_v57 = vsel %vm6094_vm3, %v1975_v41, %v1976_v29 }
 0x120   : > { %v1956_v43 = vsel %vm6094_vm3, %v1954_v58, %v1955_v5 }
 0x122   : > { %5194 = vmatmul.mubr.msk.bf16.gmra.mrb[24].mxu1 %vm516_vm2, %v4498_v42  ;;  %v1959_v42 = vrot.slane %v7780_v48, 5  ;;  %v4557_v48 = vcombine.low %v1953_v24, %v1956_v43 }
 0x123   : > { %5197 = vmatprep.mubr.msk.bf16.mxu1 %vm516_vm2, %v4499_v37  ;;  %v8318_v37 = vld [vmem:[#allocation30_spill] sm:$0xff] }
 0x124   : > { %v8320_v47 = vcombine.low %v8318_v37, %v8319_v63  ;;  %v1961_v9 = vrot.slane %v1959_v42, 4  ;;  %v1960_v17 = vsel %vm6094_vm3, %v4534_v46, %v1959_v42 }
 0x125   : > { %5378 = vmatmul.mubr.msk.bf16.gmra.mrb[8].mxu0 %vm516_vm2, %v8308_v51  ;;  %v4556_v51 = vcombine.low %v1946_v39, %v1949_v4  ;;  %v7929_v4 = vld [vmem:[%s8097_s3] ss:$0 sm:$0xff] }
 0x126   : > { %5381 = vmatprep.mubr.msk.bf16.mxu0 %vm516_vm2, %v8311_v35  ;;  %v1968_v35 = vrot.slane %v1966_v61, 4  ;;  %v1963_v23 = vsel %vm6094_vm3, %v1961_v9, %v1962_v52 }
 0x127   : > { %v4558_v44 = vcombine.low %v1960_v17, %v1963_v23 }
 0x12a   : > { %5198 = vmatmul.mubr.msk.bf16.gmra.mrb[28].mxu1 %vm516_vm2, %v4500_v14  ;;  %v5889_v14 = vld [vmem:[%s6077_s29 + $0xc8] sm:$0x3]  ;;  %s202_s29 = sand.u32 1, %s5953_s16  }
 0x12b   : > { %5225 = vmatprep.mubr.msk.bf16.mxu1 %vm516_vm2, %v4553_v32  ;;  %v1969_v3 = vrot.slane %v5889_v14, 5  ;;  %v8326_v32 = vcombine.low %v8324_v28, %v8325_v60  ;;  %s4271_s22 = sshll.u32 %s202_s29, 8  ;;  %s8048_s18 = scalar_lea.sflag [#allocation3], %s202_s29 }
 0x12c   : > { %s7941_s24 = scalar_lea.vmem [#allocation2], %s4271_s22 }
 0x12d   : > { %5382 = vmatmul.mubr.msk.bf16.gmra.mrb[12].mxu0 %vm516_vm2, %v8314_v54  ;;  %v1970_v16 = vsel %vm6094_vm3, %v1968_v35, %v1969_v3  ;;  %v1974_v54 = vsel %vm6094_vm3, %v4536_v30, %v1973_v40  ;;  %s4183_s30 = sshll.u32 %s7941_s24, 4  ;;  %s8041_s30 = int_to_ptr.vmem [resolvable:$true] %s4183_s30 }
 0x12e   : > { %5385 = vmatprep.mubr.msk.bf16.mxu0 %vm516_vm2, %v8317_v15  ;;  %v4559_v31 = vcombine.low %v1967_v25, %v1970_v16  ;;  %v4560_v33 = vcombine.low %v1974_v54, %v1977_v57  ;;  %s5891_s8 = scalar_lea.vmem %s8041_s30, 4096  ;;  %p5898_p1 = scmp.lt.s32.totalorder %s8041_s30, %s5896_s10 }
 0x12f   : > { %p5892_p12 = scmp.ne.s32.totalorder %s8041_s30, %s5891_s8  ;;  %p5899_p2 = scmp.lt.s32.totalorder %s5897_s11, %s5891_s8 }
 0x131   : > { %p5893_p13 = pnand %p5892_p12, %p6039_p4  ;;  %p5900_p3 = por %p5899_p2, %p5898_p1 }
 0x132   : > { %5226 = vmatmul.mubr.msk.bf16.vlgmr.msra.gmra.mrb[16].mxu1 %vm516_vm2, %v4554_v8 }
 0x133   : > { %5229 = vmatprep.mubr.msk.bf16.mxu1 %vm516_vm2, %v4555_v1  ;;  %p5894_p0 = pneg %p5893_p13 }
 0x135   : > { %5386 = vmatmul.mubr.msk.bf16.gmra.mrb[16].mxu0 %vm516_vm2, %v8320_v47  ;;  %p5901_p5 = pnand %p5900_p3, %p5894_p0 }
 0x136   : > { %5389 = vmatprep.mubr.msk.bf16.mxu0 %vm516_vm2, %v8323_v49 }
 0x13a   : > { %5230 = vmatmul.mubr.msk.bf16.gmra.mrb[20].mxu1 %vm516_vm2, %v4556_v51 }
 0x13b   : > { %5233 = vmatprep.mubr.msk.bf16.mxu1 %vm516_vm2, %v4557_v48 }
 0x13d   : > { %5390 = vmatmul.mubr.msk.bf16.gmra.mrb[20].mxu0 %vm516_vm2, %v8326_v32 }
 0x13e   : > { %5393 = vmatprep.mubr.msk.bf16.mxu0 %vm516_vm2, %v8329_v56 }
 0x142   : > { %5234 = vmatmul.mubr.msk.bf16.gmra.mrb[24].mxu1 %vm516_vm2, %v4558_v44 }
 0x143   : > { %5237 = vmatprep.mubr.msk.bf16.mxu1 %vm516_vm2, %v4559_v31 }
 0x145   : > { %5394 = vmatmul.mubr.msk.bf16.gmra.mrb[24].mxu0 %vm516_vm2, %v8332_v18 }
 0x146   : > { %5397 = vmatprep.mubr.msk.bf16.mxu0 %vm516_vm2, %v4831_v27 }
 0x14a   : > { %5238 = vmatmul.mubr.msk.bf16.gmra.mrb[28].mxu1 %vm516_vm2, %v4560_v33 }
 0x14d   : > { %5398 = vmatmul.mubr.msk.bf16.gmra.mrb[28].mxu0 %vm516_vm2, %v4832_v20 }
 0x1c5   : > { %v5171_v11 = vpop.f32.mrb[0].mxu1 }
 0x1c6   : > { %v1691_v34 = vpop.f32.mrb[1].mxu1 }
 0x1c7   : > { %v5172_v15 = vpop.f32.mrb[2].mxu1 }
 0x1c8   : > { %v1694_v8 = vpop.f32.mrb[3].mxu1 }
 0x1cd   : > { %v5175_v1 = vpop.f32.mrb[4].mxu1 }
 0x1ce   : > { %v1707_v6 = vpop.f32.mrb[5].mxu1 }
 0x1cf   : > { %v5176_v45 = vpop.f32.mrb[6].mxu1 }
 0x1d0   : > { %v1710_v2 = vpop.f32.mrb[7].mxu1 }
 0x1d5   : > { %v5179_v59 = vpop.f32.mrb[8].mxu1 }
 0x1d6   : > { %v1723_v13 = vpop.f32.mrb[9].mxu1 }
 0x1d7   : > { %v7908_v27 = vpop.f32.mrb[10].mxu1 }
 0x1d8   : > { %v7910_v12 = vpop.f32.mrb[11].mxu1 }
 0x1dd   : > { %v7912_v10 = vpop.f32.mrb[12].mxu1 }
 0x1de   : > { %v7914_v21 = vpop.f32.mrb[13].mxu1 }
 0x1df   : > { %v7916_v62 = vpop.f32.mrb[14].mxu1 }
 0x1e0   : > { %v7918_v20 = vpop.f32.mrb[15].mxu1 }
 0x1e8   : > { %v5371_v58 = vpop.f32.mrb[0].mxu0 }
 0x1e9   : > { %v5409_v5 = vadd.f32 %v5371_v58, %v5171_v11  ;;  %v3865_v39 = vpop.f32.mrb[1].mxu0 }
 0x1ea   : > { %v5410_v42 = vadd.f32 %v3865_v39, %v1691_v34  ;;  %v5372_v37 = vpop.f32.mrb[2].mxu0 }
 0x1eb   : > { %v4033_v63 = vmul.f32 %v5409_v5, %v7924_v36  ;;  %v5411_v47 = vadd.f32 %v5372_v37, %v5172_v15  ;;  %v3868_v24 = vpop.f32.mrb[3].mxu0 }
 0x1ec   : > { %v4031_v43 = vmul.f32 %v5410_v42, %v7924_v36  ;;  %v5412_v61 = vadd.f32 %v3868_v24, %v1694_v8 }
 0x1ed   : > { %v4072_v0 = vadd.f32 %v7929_v4, %v4033_v63  ;;  %v4034_v50 = vmul.f32 %v5411_v47, %v7924_v36 }
 0x1ee   : > { %v4070_v49 = vadd.f32 %v7929_v4, %v4031_v43  ;;  %v4032_v51 = vmul.f32 %v5412_v61, %v7924_v36 }
 0x1ef   : > { %v4104_v48 = vmax.f32 %v4072_v0, 0.0  ;;  %v4073_v46 = vadd.f32 %v7929_v4, %v4034_v50 }
 0x1f0   : > { %v4102_v9 = vmax.f32 %v4070_v49, 0.0  ;;  %v4071_v22 = vadd.f32 %v7929_v4, %v4032_v51  ;;  %v5375_v52 = vpop.f32.mrb[4].mxu0 }
 0x1f1   : > { %4136 = vst [vmem:[%s7941_s24 + $0x10] sm:$0xff] %v4104_v48  ;;  %v4105_v26 = vmax.f32 %v4073_v46, 0.0  ;;  %v5413_v35 = vadd.f32 %v5375_v52, %v5175_v1  ;;  %v3881_v14 = vpop.f32.mrb[5].mxu0 }
 0x1f2   : > { %4134 = vst [vmem:[%s7941_s24] sm:$0xff] %v4102_v9  ;;  %v4103_v3 = vmax.f32 %v4071_v22, 0.0  ;;  %v5414_v17 = vadd.f32 %v3881_v14, %v1707_v6  ;;  %v5376_v23 = vpop.f32.mrb[6].mxu0 }
 0x1f3   : > { %4137 = vst [vmem:[%s7941_s24 + $0x18] sm:$0xff] %v4105_v26  ;;  %v4037_v40 = vmul.f32 %v5413_v35, %v7924_v36  ;;  %v5415_v28 = vadd.f32 %v5376_v23, %v5176_v45  ;;  %v3884_v60 = vpop.f32.mrb[7].mxu0 }
 0x1f4   : > { %4135 = vst [vmem:[%s7941_s24 + $0x8] sm:$0xff] %v4103_v3  ;;  %v4035_v32 = vmul.f32 %v5414_v17, %v7924_v36  ;;  %v5416_v25 = vadd.f32 %v3884_v60, %v1710_v2 }
 0x1f5   : > { %v4076_v16 = vadd.f32 %v7929_v4, %v4037_v40  ;;  %v4038_v19 = vmul.f32 %v5415_v28, %v7924_v36 }
 0x1f6   : > { %v4074_v7 = vadd.f32 %v7929_v4, %v4035_v32  ;;  %v4036_v56 = vmul.f32 %v5416_v25, %v7924_v36 }
 0x1f7   : > { %v4108_v44 = vmax.f32 %v4076_v16, 0.0  ;;  %v4077_v31 = vadd.f32 %v7929_v4, %v4038_v19 }
 0x1f8   : > { %v4106_v30 = vmax.f32 %v4074_v7, 0.0  ;;  %v4075_v41 = vadd.f32 %v7929_v4, %v4036_v56  ;;  %v5379_v53 = vpop.f32.mrb[8].mxu0 }
 0x1f9   : > { %4140 = vst [vmem:[%s7941_s24 + $0x30] sm:$0xff] %v4108_v44  ;;  %v4109_v29 = vmax.f32 %v4077_v31, 0.0  ;;  %v5417_v54 = vadd.f32 %v5379_v53, %v5179_v59  ;;  %v3897_v57 = vpop.f32.mrb[9].mxu0 }
 0x1fa   : > { %4138 = vst [vmem:[%s7941_s24 + $0x20] sm:$0xff] %v4106_v30  ;;  %v4107_v38 = vmax.f32 %v4075_v41, 0.0  ;;  %v5418_v55 = vadd.f32 %v3897_v57, %v1723_v13  ;;  %v5380_v18 = vpop.f32.mrb[10].mxu0 }
 0x1fb   : > { %4141 = vst [vmem:[%s7941_s24 + $0x38] sm:$0xff] %v4109_v29  ;;  %v4041_v33 = vmul.f32 %v5417_v54, %v7924_v36  ;;  %v5419_v11 = vadd.f32 %v5380_v18, %v7908_v27  ;;  %v3900_v34 = vpop.f32.mrb[11].mxu0 }
 0x1fc   : > { %4139 = vst [vmem:[%s7941_s24 + $0x28] sm:$0xff] %v4107_v38  ;;  %v4039_v15 = vmul.f32 %v5418_v55, %v7924_v36  ;;  %v5420_v8 = vadd.f32 %v3900_v34, %v7910_v12 }
 0x1fd   : > { %v4080_v1 = vadd.f32 %v7929_v4, %v4041_v33  ;;  %v4042_v6 = vmul.f32 %v5419_v11, %v7924_v36 }
 0x1fe   : > { %v4078_v45 = vadd.f32 %v7929_v4, %v4039_v15  ;;  %v4040_v2 = vmul.f32 %v5420_v8, %v7924_v36 }
 0x1ff   : > { %v4112_v59 = vmax.f32 %v4080_v1, 0.0  ;;  %v4081_v13 = vadd.f32 %v7929_v4, %v4042_v6 }
 0x200   : > { %v4110_v27 = vmax.f32 %v4078_v45, 0.0  ;;  %v4079_v58 = vadd.f32 %v7929_v4, %v4040_v2  ;;  %v5383_v5 = vpop.f32.mrb[12].mxu0 }
 0x201   : > { %4144 = vst [vmem:[%s7941_s24 + $0x50] sm:$0xff] %v4112_v59  ;;  %v4113_v39 = vmax.f32 %v4081_v13, 0.0  ;;  %v5421_v12 = vadd.f32 %v5383_v5, %v7912_v10  ;;  %v3913_v42 = vpop.f32.mrb[13].mxu0 }
 0x202   : > { %4142 = vst [vmem:[%s7941_s24 + $0x40] sm:$0xff] %v4110_v27  ;;  %v4111_v37 = vmax.f32 %v4079_v58, 0.0  ;;  %v5422_v63 = vadd.f32 %v3913_v42, %v7914_v21  ;;  %v5384_v47 = vpop.f32.mrb[14].mxu0 }
 0x203   : > { %4145 = vst [vmem:[%s7941_s24 + $0x58] sm:$0xff] %v4113_v39  ;;  %v4045_v24 = vmul.f32 %v5421_v12, %v7924_v36  ;;  %v5423_v43 = vadd.f32 %v5384_v47, %v7916_v62  ;;  %v3916_v61 = vpop.f32.mrb[15].mxu0 }
 0x204   : > { %4143 = vst [vmem:[%s7941_s24 + $0x48] sm:$0xff] %v4111_v37  ;;  %v4043_v0 = vmul.f32 %v5422_v63, %v7924_v36  ;;  %v5424_v50 = vadd.f32 %v3916_v61, %v7918_v20 }
 0x205   : > { %v4084_v10 = vadd.f32 %v7929_v4, %v4045_v24  ;;  %v4046_v49 = vmul.f32 %v5423_v43, %v7924_v36  ;;  %v5227_v48 = vpop.f32.mrb[16].mxu1 }
 0x206   : > { %v4082_v21 = vadd.f32 %v7929_v4, %v4043_v0  ;;  %v4044_v51 = vmul.f32 %v5424_v50, %v7924_v36  ;;  %v2205_v9 = vpop.f32.mrb[17].mxu1 }
 0x207   : > { %v4116_v46 = vmax.f32 %v4084_v10, 0.0  ;;  %v4085_v62 = vadd.f32 %v7929_v4, %v4046_v49  ;;  %v5228_v26 = vpop.f32.mrb[18].mxu1 }
 0x208   : > { %v4114_v22 = vmax.f32 %v4082_v21, 0.0  ;;  %v4083_v52 = vadd.f32 %v7929_v4, %v4044_v51  ;;  %v5387_v20 = vpop.f32.mrb[16].mxu0  ;;  %v2208_v17 = vpop.f32.mrb[19].mxu1 }
 0x209   : > { %4148 = vst [vmem:[%s7941_s24 + $0x70] sm:$0xff] %v4116_v46  ;;  %v4117_v35 = vmax.f32 %v4085_v62, 0.0  ;;  %v5425_v14 = vadd.f32 %v5387_v20, %v5227_v48  ;;  %v3929_v3 = vpop.f32.mrb[17].mxu0 }
 0x20a   : > { %4146 = vst [vmem:[%s7941_s24 + $0x60] sm:$0xff] %v4114_v22  ;;  %v4115_v23 = vmax.f32 %v4083_v52, 0.0  ;;  %v5426_v40 = vadd.f32 %v3929_v3, %v2205_v9  ;;  %v5388_v28 = vpop.f32.mrb[18].mxu0 }
 0x20b   : > { %4149 = vst [vmem:[%s7941_s24 + $0x78] sm:$0xff] %v4117_v35  ;;  %v4049_v60 = vmul.f32 %v5425_v14, %v7924_v36  ;;  %v5427_v32 = vadd.f32 %v5388_v28, %v5228_v26  ;;  %v3932_v25 = vpop.f32.mrb[19].mxu0 }
 0x20c   : > { %4147 = vst [vmem:[%s7941_s24 + $0x68] sm:$0xff] %v4115_v23  ;;  %v4047_v16 = vmul.f32 %v5426_v40, %v7924_v36  ;;  %v5428_v19 = vadd.f32 %v3932_v25, %v2208_v17 }
 0x20d   : > { %v4088_v7 = vadd.f32 %v7929_v4, %v4049_v60  ;;  %v4050_v56 = vmul.f32 %v5427_v32, %v7924_v36  ;;  %v5231_v30 = vpop.f32.mrb[20].mxu1 }
 0x20e   : > { %v4086_v44 = vadd.f32 %v7929_v4, %v4047_v16  ;;  %v4048_v31 = vmul.f32 %v5428_v19, %v7924_v36  ;;  %v2221_v29 = vpop.f32.mrb[21].mxu1 }
 0x20f   : > { %v4120_v41 = vmax.f32 %v4088_v7, 0.0  ;;  %v4089_v53 = vadd.f32 %v7929_v4, %v4050_v56  ;;  %v5232_v55 = vpop.f32.mrb[22].mxu1 }
 0x210   : > { %v4118_v54 = vmax.f32 %v4086_v44, 0.0  ;;  %v4087_v57 = vadd.f32 %v7929_v4, %v4048_v31  ;;  %v5391_v38 = vpop.f32.mrb[20].mxu0  ;;  %v2224_v34 = vpop.f32.mrb[23].mxu1 }
 0x211   : > { %4152 = vst [vmem:[%s7941_s24 + $0x90] sm:$0xff] %v4120_v41  ;;  %v4121_v18 = vmax.f32 %v4089_v53, 0.0  ;;  %v5429_v33 = vadd.f32 %v5391_v38, %v5231_v30  ;;  %v3945_v11 = vpop.f32.mrb[21].mxu0 }
 0x212   : > { %4150 = vst [vmem:[%s7941_s24 + $0x80] sm:$0xff] %v4118_v54  ;;  %v4119_v15 = vmax.f32 %v4087_v57, 0.0  ;;  %v5430_v8 = vadd.f32 %v3945_v11, %v2221_v29  ;;  %v5392_v1 = vpop.f32.mrb[22].mxu0 }
 0x213   : > { %4153 = vst [vmem:[%s7941_s24 + $0x98] sm:$0xff] %v4121_v18  ;;  %v4053_v6 = vmul.f32 %v5429_v33, %v7924_v36  ;;  %v5431_v45 = vadd.f32 %v5392_v1, %v5232_v55  ;;  %v3948_v2 = vpop.f32.mrb[23].mxu0 }
 0x214   : > { %4151 = vst [vmem:[%s7941_s24 + $0x88] sm:$0xff] %v4119_v15  ;;  %v4051_v59 = vmul.f32 %v5430_v8, %v7924_v36  ;;  %v5432_v13 = vadd.f32 %v3948_v2, %v2224_v34 }
 0x215   : > { %v4092_v27 = vadd.f32 %v7929_v4, %v4053_v6  ;;  %v4054_v58 = vmul.f32 %v5431_v45, %v7924_v36  ;;  %v5235_v12 = vpop.f32.mrb[24].mxu1 }
 0x216   : > { %v4090_v5 = vadd.f32 %v7929_v4, %v4051_v59  ;;  %v4052_v39 = vmul.f32 %v5432_v13, %v7924_v36  ;;  %v2237_v63 = vpop.f32.mrb[25].mxu1 }
 0x217   : > { %v4124_v42 = vmax.f32 %v4092_v27, 0.0  ;;  %v4093_v37 = vadd.f32 %v7929_v4, %v4054_v58  ;;  %v5236_v61 = vpop.f32.mrb[26].mxu1 }
 0x218   : > { %v4122_v47 = vmax.f32 %v4090_v5, 0.0  ;;  %v4091_v24 = vadd.f32 %v7929_v4, %v4052_v39  ;;  %v5395_v43 = vpop.f32.mrb[24].mxu0  ;;  %v2240_v49 = vpop.f32.mrb[27].mxu1 }
 0x219   : > { %4156 = vst [vmem:[%s7941_s24 + $0xb0] sm:$0xff] %v4124_v42  ;;  %v4125_v0 = vmax.f32 %v4093_v37, 0.0  ;;  %v5433_v50 = vadd.f32 %v5395_v43, %v5235_v12  ;;  %v3961_v10 = vpop.f32.mrb[25].mxu0 }
 0x21a   : > { %4154 = vst [vmem:[%s7941_s24 + $0xa0] sm:$0xff] %v4122_v47  ;;  %v4123_v21 = vmax.f32 %v4091_v24, 0.0  ;;  %v5434_v51 = vadd.f32 %v3961_v10, %v2237_v63  ;;  %v5396_v48 = vpop.f32.mrb[26].mxu0 }
 0x21b   : > { %4157 = vst [vmem:[%s7941_s24 + $0xb8] sm:$0xff] %v4125_v0  ;;  %v4057_v46 = vmul.f32 %v5433_v50, %v7924_v36  ;;  %v5435_v62 = vadd.f32 %v5396_v48, %v5236_v61  ;;  %v3964_v9 = vpop.f32.mrb[27].mxu0 }
 0x21c   : > { %4155 = vst [vmem:[%s7941_s24 + $0xa8] sm:$0xff] %v4123_v21  ;;  %v4055_v22 = vmul.f32 %v5434_v51, %v7924_v36  ;;  %v5436_v52 = vadd.f32 %v3964_v9, %v2240_v49 }
 0x21d   : > { %v4096_v20 = vadd.f32 %v7929_v4, %v4057_v46  ;;  %v4058_v26 = vmul.f32 %v5435_v62, %v7924_v36  ;;  %v5239_v3 = vpop.f32.mrb[28].mxu1 }
 0x21e   : > { %v4094_v35 = vadd.f32 %v7929_v4, %v4055_v22  ;;  %v4056_v14 = vmul.f32 %v5436_v52, %v7924_v36  ;;  %v2253_v40 = vpop.f32.mrb[29].mxu1 }
 0x21f   : > { %v4128_v17 = vmax.f32 %v4096_v20, 0.0  ;;  %v4097_v23 = vadd.f32 %v7929_v4, %v4058_v26  ;;  %v5240_v25 = vpop.f32.mrb[30].mxu1 }
 0x220   : > { %v4126_v28 = vmax.f32 %v4094_v35, 0.0  ;;  %v4095_v60 = vadd.f32 %v7929_v4, %v4056_v14  ;;  %v5399_v32 = vpop.f32.mrb[28].mxu0  ;;  %v2256_v56 = vpop.f32.mrb[31].mxu1 }
 0x221   : > { %4160 = vst [vmem:[%s7941_s24 + $0xd0] sm:$0xff] %v4128_v17  ;;  %v4129_v16 = vmax.f32 %v4097_v23, 0.0  ;;  %v5437_v19 = vadd.f32 %v5399_v32, %v5239_v3  ;;  %v3977_v7 = vpop.f32.mrb[29].mxu0 }
 0x222   : > { %4158 = vst [vmem:[%s7941_s24 + $0xc0] sm:$0xff] %v4126_v28  ;;  %v4127_v44 = vmax.f32 %v4095_v60, 0.0  ;;  %v5438_v31 = vadd.f32 %v3977_v7, %v2253_v40  ;;  %v5400_v30 = vpop.f32.mrb[30].mxu0 }
 0x223   : > { %4161 = vst [vmem:[%s7941_s24 + $0xd8] sm:$0xff] %v4129_v16  ;;  %v4061_v41 = vmul.f32 %v5437_v19, %v7924_v36  ;;  %v5439_v53 = vadd.f32 %v5400_v30, %v5240_v25  ;;  %v3980_v29 = vpop.f32.mrb[31].mxu0 }
 0x224   : > { %4159 = vst [vmem:[%s7941_s24 + $0xc8] sm:$0xff] %v4127_v44  ;;  %v4059_v54 = vmul.f32 %v5438_v31, %v7924_v36  ;;  %v5440_v57 = vadd.f32 %v3980_v29, %v2256_v56 }
 0x225   : > { %v4100_v38 = vadd.f32 %v7929_v4, %v4061_v41  ;;  %v4062_v55 = vmul.f32 %v5439_v53, %v7924_v36 }
 0x226   : > { %v4098_v18 = vadd.f32 %v7929_v4, %v4059_v54  ;;  %v4060_v33 = vmul.f32 %v5440_v57, %v7924_v36 }
 0x227   : > { %v4132_v11 = vmax.f32 %v4100_v38, 0.0  ;;  %v4101_v34 = vadd.f32 %v7929_v4, %v4062_v55 }
 0x228   : > { %v4130_v15 = vmax.f32 %v4098_v18, 0.0  ;;  %v4099_v8 = vadd.f32 %v7929_v4, %v4060_v33 }
 0x229   : > { %4164 = vst [vmem:[%s7941_s24 + $0xf0] sm:$0xff] %v4132_v11  ;;  %v4133_v1 = vmax.f32 %v4101_v34, 0.0 }
 0x22a   : > { %4162 = vst [vmem:[%s7941_s24 + $0xe0] sm:$0xff] %v4130_v15  ;;  %v4131_v36 = vmax.f32 %v4099_v8, 0.0 }
 0x22b   : > { %4165 = vst [vmem:[%s7941_s24 + $0xf8] sm:$0xff] %v4133_v1 }
 0x22c   : > { %4163 = vst [vmem:[%s7941_s24 + $0xe8] sm:$0xff] %v4131_v36 }
 0x22d   : > { %5904 = shalt.err (!%p5901_p5)
}
 0x22e   : > { %s5905_s29 = scalar_lea.hbm %s8039_s7, 4096  ;;  %s5909_s14 = scalar_lea.hbm %s8098_s4, 8192 }
 0x22f   : > { %p5906_p6 = scmp.ne.s32.totalorder %s8039_s7, %s5905_s29  ;;  %p5910_p10 = scmp.lt.u32.totalorder %s8039_s7, %s8098_s4 }
 0x230   : > { %p5911_p11 = scmp.lt.u32.totalorder %s5909_s14, %s5905_s29  ;;  %p5913_p13 = scmp.lt.u32.totalorder %s5905_s29, %s8039_s7 }
 0x231   : > { %p5907_p7 = pnand %p5906_p6, %p6039_p4 }
 0x232   : > { %p5912_p12 = por %p5911_p11, %p5910_p10 }
 0x233   : > { %p5908_p9 = pneg %p5907_p7 }
 0x234   : > { %p5914_p0 = por %p5913_p13, %p5912_p12 }
 0x236   : > { %p5915_p1 = pnand %p5914_p0, %p5908_p9 }
 0x238   : > { %5918 = shalt.err (!%p5915_p1)
}
 0x239   : > { %s5972_s24 = smov 128   ;;  %s5973_s26 = smov 8  }
 0x23a   : > { %5666 = dma.vmem_to_hbm [thread:$0]  (%p6039_p4), %s8041_s30, 4096, %s8039_s7, %s8048_s18, %s5972_s24, %s5972_s24, %s5973_s26  }
 0x23b PF: > { %p5672_p2 = scmp.ge.s32.totalorder %s5969_s20, 2  ;;  %s4198_s5 = sand.u32 1, %s5949_s15  }
 0x23c   : > { %s4199_s6 = scalar_lea.sflag [#allocation3], %s4198_s5 }
 0x23d   : > { %p5669_p3 = pnand %p5672_p2, %p6046_p8 }
 0x23f   : > { %5944 = dma.done.wait (!%p5669_p3), %s4199_s6, 4096  }
 0x240   : > { %5946 = vsyncadd (!%p5669_p3), %s4199_s6, 4294963200  ;;  %s17_s20 = sadd.s32 1, %s5969_s20   ;;  %s8333_s15 = smov %s5953_s16 }
 0x241   : > { %p14_p5 = scmp.ge.s32.totalorder %s17_s20, 4   ;;  %s8334_s16 = smov %s5957_s17 }
 0x242   : > { %s8335_s17 = smov %s6052_s28  ;;  %s8336_s18 = smov %s5965_s19 }
 0x243   : > { %s8337_s19 = smov %s8339_s23  ;;  %16 = sbr.rel (!%p14_p5) target bundleno = 4 (0x4), region = 82 }
 0x24a   :  { %4204 = vsyncpa [#allocation3], 1 }
 0x24b   :  { %4206 = vsyncpa [#allocation3 + $0x1], 1 }

</bundles_post_ra>
